<compile_context>
chip_gen: v5e
topology: v5e:2x2
jax: 0.10.0
libtpu: 0.0.40
codegen_flags: <defaults>
</compile_context>

<pallas_src>
import functools

import jax
import jax.numpy as jnp
from jax.experimental import pallas as pl
from jax.experimental.pallas import tpu as pltpu


def _dwsep_kernel(x_ref, wf_ref, bf_ref, o_ref, xflat_ref, rhs_ref, *,
                  H, W, H_tile, KH, KW, dil, pad, Wp, n_rows, flat_len,
                  Cin, Cout):
    """One (batch, row-strip) step of the fused depthwise-separable conv.

    x_ref    : (1, Cin, H, W)          unpadded image of one batch element
    wf_ref   : (Cout, KH*KW*Cin)       fused depthwise*pointwise weights
    bf_ref   : (Cout, 1)               fused bias (f32)
    o_ref    : (1, Cout, H_tile*Wp)    strip output, rows flattened at the
                                       padded row stride Wp (junk columns
                                       w >= W_out are dropped on the host)
    xflat_ref: (Cin, flat_len)         VMEM scratch: zero-padded strip
    rhs_ref  : (KH*KW*Cin, H_tile*Wp)  VMEM scratch: im2col stack
    """
    s = pl.program_id(1)
    row0 = s * H_tile                       # first output row of this strip
    L = H_tile * Wp
    dt = xflat_ref.dtype

    # ---- zero only the pad / gap columns (data columns are overwritten) ----
    def _zero(a, b):
        if b > a:
            xflat_ref[:, a:b] = jnp.zeros((Cin, b - a), dt)

    _zero(0, pad)
    for r in range(n_rows - 1):
        _zero(r * Wp + pad + W, (r + 1) * Wp + pad)
    _zero((n_rows - 1) * Wp + pad + W, flat_len)

    # ---- copy the strip rows (OOB halo rows are masked to zero) ----
    for r in range(n_rows):                 # static, small (H_tile + halo)
        src = row0 + (r - pad)              # source row in the unpadded image
        inb = jnp.logical_and(src >= 0, src < H)
        srcc = jnp.clip(src, 0, H - 1)      # clamp so the load is never OOB
        row = x_ref[0, :, pl.ds(srcc, 1), :][:, 0, :]            # (Cin, W)
        row = jnp.where(inb, row, jnp.zeros_like(row))
        xflat_ref[:, r * Wp + pad: r * Wp + pad + W] = row

    # ---- im2col stack: KH*KW lane-shifted slice copies of the strip ----
    for kh in range(KH):
        for kw in range(KW):
            t = kh * KW + kw
            off = kh * dil * Wp + kw * dil                       # static
            rhs_ref[t * Cin:(t + 1) * Cin, :] = xflat_ref[:, off: off + L]

    # ---- one MXU matmul with contraction depth KH*KW*Cin ----
    acc = jnp.dot(wf_ref[...], rhs_ref[...],
                  preferred_element_type=jnp.float32)            # (Cout, L)
    acc = acc + bf_ref[...].astype(jnp.float32)                  # (Cout,1) bcast
    o_ref[0] = acc.astype(o_ref.dtype)


def _pick_h_tile(H_out, Wp, Cin, Cout, KK, itemsize, N):
    """Pick the row-strip height.

    Constraints:
      * H_tile divides H_out (exact flattening, no remainder strip).
      * n_strips == 1 or (H_tile*Wp) % 128 == 0, so the flattened output block
        is valid/lane-dense and the output can be emitted as
        (N, Cout, H_out*Wp) with no host-side transpose.
      * f32 matmul result (Cout, H_tile*Wp) stays roughly vreg-file sized and
        the im2col stack stays a few MiB of VMEM.
    """
    cands = []
    for t in range(1, H_out + 1):
        if H_out % t:
            continue
        n_strips = H_out // t
        L = t * Wp
        if n_strips > 1 and L % 128:
            continue
        if Cout * L * 4 > (128 << 10):            # dot result ~ vreg file
            continue
        if KK * Cin * L * itemsize > (4 << 20):   # im2col stack
            continue
        cands.append(t)
    if not cands:
        # TODO(synk): for enormous H*Wp, split the lane dimension in-kernel
        # instead of falling back to one oversized strip.
        return H_out
    dense = [t for t in cands if t * Wp >= 128] or cands
    if N == 1:
        # Keep both v7x TensorCores busy on single-image workloads.
        multi = [t for t in dense if H_out // t >= 2]
        if multi:
            dense = multi
    return max(dense)


def depthwise_separable_conv(x, dw_w, dw_b, pw_w, pw_b, *, padding, dilation=1):
    """x: (N, Cin, H, W).  dw_w: (Cin, 1, KH, KW), dw_b: (Cin,),
    pw_w: (Cout, Cin, 1, 1), pw_b: (Cout,).  Returns (N, Cout, H_out, W_out).

    Stride-1 convs only (matches the module); the flattened junk-column
    formulation below assumes it.
    """
    N, Cin, H, W = x.shape
    KH, KW = int(dw_w.shape[2]), int(dw_w.shape[3])
    Cout = int(pw_w.shape[0])
    KK = KH * KW

    H_out = H + 2 * padding - dilation * (KH - 1)
    W_out = W + 2 * padding - dilation * (KW - 1)
    assert H_out > 0 and W_out > 0

    # Flattened row stride.  For wide rows, round up to a 128 multiple so tap
    # offsets and output stores are lane-aligned; for tiny rows (e.g. W=16)
    # the inflation would dominate, so keep the exact stride.
    Wp = W + 2 * padding
    if Wp >= 96:
        Wp = ((Wp + 127) // 128) * 128
    itemsize = x.dtype.itemsize

    # Fold depthwise taps into the pointwise weights (single-matmul form).
    pw2 = pw_w[:, :, 0, 0].astype(jnp.float32)                   # (Cout, Cin)
    dwk = dw_w[:, 0, :, :].astype(jnp.float32)                   # (Cin, KH, KW)
    taps = jnp.transpose(dwk, (1, 2, 0)).reshape(KK, Cin)        # (KK, Cin)
    wf = (pw2[:, None, :] * taps[None, :, :]).reshape(Cout, KK * Cin)
    wf = wf.astype(x.dtype)
    bf = (pw_b.astype(jnp.float32) +
          pw2 @ dw_b.astype(jnp.float32)).reshape(Cout, 1)

    H_tile = _pick_h_tile(H_out, Wp, Cin, Cout, KK, itemsize, N)
    n_strips = H_out // H_tile
    L = H_tile * Wp
    n_rows = H_tile + (KH - 1) * dilation          # strip rows incl. halo
    flat_len = n_rows * Wp + (KW - 1) * dilation

    kernel = functools.partial(
        _dwsep_kernel, H=H, W=W, H_tile=H_tile, KH=KH, KW=KW, dil=dilation,
        pad=padding, Wp=Wp, n_rows=n_rows, flat_len=flat_len,
        Cin=Cin, Cout=Cout)

    # Advisory cost estimate for XLA's scheduler (valid output columns only).
    flops = 2 * N * H_out * W_out * KK * Cin * Cout
    bytes_accessed = int(x.size * itemsize + N * Cout * H_out * Wp * itemsize
                         + wf.size * itemsize + bf.size * 4)
    cost = pl.CostEstimate(flops=flops, transcendentals=0,
                           bytes_accessed=bytes_accessed)

    # Generation-aware scoped-VMEM budget (lane/sublane padded, double
    # buffered inputs/outputs + single-instance scratches).
    def _rup(v, m):
        return ((v + m - 1) // m) * m
    in_blk = Cin * _rup(H, 8) * _rup(W, 128) * itemsize
    out_blk = _rup(Cout, 8) * _rup(L, 128) * itemsize
    w_blk = (_rup(Cout, 8) * _rup(KK * Cin, 128) * itemsize
             + _rup(Cout, 8) * 128 * 4)
    xflat_blk = _rup(Cin, 8) * _rup(flat_len, 128) * itemsize
    rhs_blk = _rup(KK * Cin, 8) * _rup(L, 128) * itemsize
    vmem_need = 2 * (in_blk + out_blk + w_blk) + xflat_blk + rhs_blk + (2 << 20)
    try:
        vmem_cap = int(getattr(pltpu.get_tpu_info(), "vmem_capacity_bytes",
                               64 << 20))
    except Exception:  # pragma: no cover - defensive, e.g. interpret mode
        vmem_cap = 64 << 20
    target = (vmem_cap * 3) // 4            # ~96 MiB v5e/v6e, ~48 MiB v7x
    vmem_limit = int(min(max(vmem_need, 16 << 20), target))
    vmem_limit = int(max(vmem_limit, min(vmem_need, (vmem_cap * 9) // 10)))

    out_flat = pl.pallas_call(
        kernel,
        out_shape=jax.ShapeDtypeStruct((N, Cout, n_strips * L), x.dtype),
        grid_spec=pltpu.PrefetchScalarGridSpec(
            num_scalar_prefetch=0,
            grid=(N, n_strips),
            in_specs=[
                # Full image per batch element; re-DMA'd only when `n` changes.
                # TODO(synk): for very large images, DMA halo'd row strips
                # manually (memory_space=pl.ANY + make_async_copy, or
                # pipeline_mode=pl.Buffered(1) on this spec) so VMEM scales
                # with H_tile instead of H.
                pl.BlockSpec((1, Cin, H, W), lambda n, s: (n, 0, 0, 0)),
                pl.BlockSpec((Cout, KK * Cin), lambda n, s: (0, 0)),
                pl.BlockSpec((Cout, 1), lambda n, s: (0, 0)),
            ],
            out_specs=pl.BlockSpec((1, Cout, L), lambda n, s: (n, 0, s)),
            scratch_shapes=[
                pltpu.VMEM((Cin, flat_len), x.dtype),      # zero-padded strip
                pltpu.VMEM((KK * Cin, L), x.dtype),        # im2col stack
            ]),
        compiler_params=pltpu.CompilerParams(
            dimension_semantics=("parallel", "parallel"),
            vmem_limit_bytes=vmem_limit),
        cost_estimate=cost,
    )(x, wf, bf)

    # (N, Cout, H_out*Wp) -> (N, Cout, H_out, W_out): free reshape (the strip
    # flattening is already row-major at stride Wp) + one column slice.  No
    # transpose epilogue, no extra HBM pass over a permuted copy.
    out = out_flat.reshape(N, Cout, H_out, Wp)
    return out[:, :, :, :W_out]


def _reference(x_nchw, dw_w, dw_b, pw_w, pw_b, *, padding, dilation):
    # Pure-JAX reference using lax conv (matches torch Conv2d semantics).
    Cin = x_nchw.shape[1]
    dn = jax.lax.conv_dimension_numbers(x_nchw.shape, dw_w.shape,
                                        ('NCHW', 'OIHW', 'NCHW'))
    y = jax.lax.conv_general_dilated(
        x_nchw, dw_w, window_strides=(1, 1),
        padding=[(padding, padding), (padding, padding)],
        rhs_dilation=(dilation, dilation),
        dimension_numbers=dn, feature_group_count=Cin)
    y = y + dw_b.reshape(1, -1, 1, 1)
    dn2 = jax.lax.conv_dimension_numbers(y.shape, pw_w.shape,
                                         ('NCHW', 'OIHW', 'NCHW'))
    z = jax.lax.conv_general_dilated(
        y, pw_w, window_strides=(1, 1), padding=[(0, 0), (0, 0)],
        dimension_numbers=dn2)
    return z + pw_b.reshape(1, -1, 1, 1)


if __name__ == "__main__":
    # Small shapes consistent with the module: NCHW input.
    N, Cin, H, W = 2, 4, 16, 16
    Cout, K, padding, dilation = 8, 3, 1, 1

    key = jax.random.PRNGKey(0)
    k1, k2, k3, k4, k5 = jax.random.split(key, 5)

    x = jax.random.normal(k1, (N, Cin, H, W), dtype=jnp.float32)
    dw_w = jax.random.normal(k2, (Cin, 1, K, K), dtype=jnp.float32) * 0.2
    dw_b = jax.random.normal(k3, (Cin,), dtype=jnp.float32) * 0.1
    pw_w = jax.random.normal(k4, (Cout, Cin, 1, 1), dtype=jnp.float32) * 0.2
    pw_b = jax.random.normal(k5, (Cout,), dtype=jnp.float32) * 0.1

    out = depthwise_separable_conv(x, dw_w, dw_b, pw_w, pw_b,
                                   padding=padding, dilation=dilation)
    out = jax.block_until_ready(out)

    ref = _reference(x, dw_w, dw_b, pw_w, pw_b,
                     padding=padding, dilation=dilation)
    assert out.shape == (N, Cout, H, W)
    assert jnp.allclose(out, ref, atol=1e-4, rtol=1e-4)
    print("KERNEL_OK")
</pallas_src>

<mosaic_0001>
module attributes {stable_mosaic.version = 11 : i64} {
  func.func @_dwsep_kernel(%arg0: i32, %arg1: i32, %arg2: memref<1x4x16x16xf32, #tpu.memory_space<vmem>>, %arg3: memref<8x36xf32, #tpu.memory_space<vmem>>, %arg4: memref<8x1xf32, #tpu.memory_space<vmem>>, %arg5: memref<1x8x288xf32, #tpu.memory_space<vmem>>, %arg6: memref<4x326xf32, #tpu.memory_space<vmem>>, %arg7: memref<36x288xf32, #tpu.memory_space<vmem>>) attributes {dimension_semantics = [#tpu.dimension_semantics<parallel>, #tpu.dimension_semantics<parallel>], iteration_bounds = array<i64: 2, 1>, scalar_prefetch = 0 : i64, scratch_operands = 2 : i64, tpu.core_type = #tpu.core_type<tc>, window_params = [{transform_indices = @transform_0, window_bounds = array<i64: 1, 4, 16, 16>}, {pipeline_mode = #tpu.pipeline_mode<synchronous>, transform_indices = @transform_1, window_bounds = array<i64: 8, 36>}, {pipeline_mode = #tpu.pipeline_mode<synchronous>, transform_indices = @transform_2, window_bounds = array<i64: 8, 1>}, {transform_indices = @transform_3, window_bounds = array<i64: 1, 8, 288>}]} {
    %c16_i32 = arith.constant 16 : i32
    %0 = arith.muli %arg1, %c16_i32 : i32
    %cst = arith.constant 0.000000e+00 : f32
    %1 = vector.broadcast %cst : f32 to vector<4x1xf32>
    %c0 = arith.constant 0 : index
    %c0_0 = arith.constant 0 : index
    %2 = vector.load %arg6[%c0, %c0_0] : memref<4x326xf32, #tpu.memory_space<vmem>>, vector<4x1xf32>
    tpu.vector_store %arg6[%c0, %c0_0], %1 {strides = array<i32>} : memref<4x326xf32, #tpu.memory_space<vmem>>, vector<4x1xf32>,
    %cst_1 = arith.constant 0.000000e+00 : f32
    %3 = vector.broadcast %cst_1 : f32 to vector<4x2xf32>
    %c0_2 = arith.constant 0 : index
    %c17 = arith.constant 17 : index
    %4 = vector.load %arg6[%c0_2, %c17] : memref<4x326xf32, #tpu.memory_space<vmem>>, vector<4x2xf32>
    tpu.vector_store %arg6[%c0_2, %c17], %3 {strides = array<i32>} : memref<4x326xf32, #tpu.memory_space<vmem>>, vector<4x2xf32>,
    %cst_3 = arith.constant 0.000000e+00 : f32
    %5 = vector.broadcast %cst_3 : f32 to vector<4x2xf32>
    %c0_4 = arith.constant 0 : index
    %c35 = arith.constant 35 : index
    %6 = vector.load %arg6[%c0_4, %c35] : memref<4x326xf32, #tpu.memory_space<vmem>>, vector<4x2xf32>
    tpu.vector_store %arg6[%c0_4, %c35], %5 {strides = array<i32>} : memref<4x326xf32, #tpu.memory_space<vmem>>, vector<4x2xf32>,
    %cst_5 = arith.constant 0.000000e+00 : f32
    %7 = vector.broadcast %cst_5 : f32 to vector<4x2xf32>
    %c0_6 = arith.constant 0 : index
    %c53 = arith.constant 53 : index
    %8 = vector.load %arg6[%c0_6, %c53] : memref<4x326xf32, #tpu.memory_space<vmem>>, vector<4x2xf32>
    tpu.vector_store %arg6[%c0_6, %c53], %7 {strides = array<i32>} : memref<4x326xf32, #tpu.memory_space<vmem>>, vector<4x2xf32>,
    %cst_7 = arith.constant 0.000000e+00 : f32
    %9 = vector.broadcast %cst_7 : f32 to vector<4x2xf32>
    %c0_8 = arith.constant 0 : index
    %c71 = arith.constant 71 : index
    %10 = vector.load %arg6[%c0_8, %c71] : memref<4x326xf32, #tpu.memory_space<vmem>>, vector<4x2xf32>
    tpu.vector_store %arg6[%c0_8, %c71], %9 {strides = array<i32>} : memref<4x326xf32, #tpu.memory_space<vmem>>, vector<4x2xf32>,
    %cst_9 = arith.constant 0.000000e+00 : f32
    %11 = vector.broadcast %cst_9 : f32 to vector<4x2xf32>
    %c0_10 = arith.constant 0 : index
    %c89 = arith.constant 89 : index
    %12 = vector.load %arg6[%c0_10, %c89] : memref<4x326xf32, #tpu.memory_space<vmem>>, vector<4x2xf32>
    tpu.vector_store %arg6[%c0_10, %c89], %11 {strides = array<i32>} : memref<4x326xf32, #tpu.memory_space<vmem>>, vector<4x2xf32>,
    %cst_11 = arith.constant 0.000000e+00 : f32
    %13 = vector.broadcast %cst_11 : f32 to vector<4x2xf32>
    %c0_12 = arith.constant 0 : index
    %c107 = arith.constant 107 : index
    %14 = vector.load %arg6[%c0_12, %c107] : memref<4x326xf32, #tpu.memory_space<vmem>>, vector<4x2xf32>
    tpu.vector_store %arg6[%c0_12, %c107], %13 {strides = array<i32>} : memref<4x326xf32, #tpu.memory_space<vmem>>, vector<4x2xf32>,
    %cst_13 = arith.constant 0.000000e+00 : f32
    %15 = vector.broadcast %cst_13 : f32 to vector<4x2xf32>
    %c0_14 = arith.constant 0 : index
    %c125 = arith.constant 125 : index
    %16 = vector.load %arg6[%c0_14, %c125] : memref<4x326xf32, #tpu.memory_space<vmem>>, vector<4x2xf32>
    tpu.vector_store %arg6[%c0_14, %c125], %15 {strides = array<i32>} : memref<4x326xf32, #tpu.memory_space<vmem>>, vector<4x2xf32>,
    %cst_15 = arith.constant 0.000000e+00 : f32
    %17 = vector.broadcast %cst_15 : f32 to vector<4x2xf32>
    %c0_16 = arith.constant 0 : index
    %c143 = arith.constant 143 : index
    %18 = vector.load %arg6[%c0_16, %c143] : memref<4x326xf32, #tpu.memory_space<vmem>>, vector<4x2xf32>
    tpu.vector_store %arg6[%c0_16, %c143], %17 {strides = array<i32>} : memref<4x326xf32, #tpu.memory_space<vmem>>, vector<4x2xf32>,
    %cst_17 = arith.constant 0.000000e+00 : f32
    %19 = vector.broadcast %cst_17 : f32 to vector<4x2xf32>
    %c0_18 = arith.constant 0 : index
    %c161 = arith.constant 161 : index
    %20 = vector.load %arg6[%c0_18, %c161] : memref<4x326xf32, #tpu.memory_space<vmem>>, vector<4x2xf32>
    tpu.vector_store %arg6[%c0_18, %c161], %19 {strides = array<i32>} : memref<4x326xf32, #tpu.memory_space<vmem>>, vector<4x2xf32>,
    %cst_19 = arith.constant 0.000000e+00 : f32
    %21 = vector.broadcast %cst_19 : f32 to vector<4x2xf32>
    %c0_20 = arith.constant 0 : index
    %c179 = arith.constant 179 : index
    %22 = vector.load %arg6[%c0_20, %c179] : memref<4x326xf32, #tpu.memory_space<vmem>>, vector<4x2xf32>
    tpu.vector_store %arg6[%c0_20, %c179], %21 {strides = array<i32>} : memref<4x326xf32, #tpu.memory_space<vmem>>, vector<4x2xf32>,
    %cst_21 = arith.constant 0.000000e+00 : f32
    %23 = vector.broadcast %cst_21 : f32 to vector<4x2xf32>
    %c0_22 = arith.constant 0 : index
    %c197 = arith.constant 197 : index
    %24 = vector.load %arg6[%c0_22, %c197] : memref<4x326xf32, #tpu.memory_space<vmem>>, vector<4x2xf32>
    tpu.vector_store %arg6[%c0_22, %c197], %23 {strides = array<i32>} : memref<4x326xf32, #tpu.memory_space<vmem>>, vector<4x2xf32>,
    %cst_23 = arith.constant 0.000000e+00 : f32
    %25 = vector.broadcast %cst_23 : f32 to vector<4x2xf32>
    %c0_24 = arith.constant 0 : index
    %c215 = arith.constant 215 : index
    %26 = vector.load %arg6[%c0_24, %c215] : memref<4x326xf32, #tpu.memory_space<vmem>>, vector<4x2xf32>
    tpu.vector_store %arg6[%c0_24, %c215], %25 {strides = array<i32>} : memref<4x326xf32, #tpu.memory_space<vmem>>, vector<4x2xf32>,
    %cst_25 = arith.constant 0.000000e+00 : f32
    %27 = vector.broadcast %cst_25 : f32 to vector<4x2xf32>
    %c0_26 = arith.constant 0 : index
    %c233 = arith.constant 233 : index
    %28 = vector.load %arg6[%c0_26, %c233] : memref<4x326xf32, #tpu.memory_space<vmem>>, vector<4x2xf32>
    tpu.vector_store %arg6[%c0_26, %c233], %27 {strides = array<i32>} : memref<4x326xf32, #tpu.memory_space<vmem>>, vector<4x2xf32>,
    %cst_27 = arith.constant 0.000000e+00 : f32
    %29 = vector.broadcast %cst_27 : f32 to vector<4x2xf32>
    %c0_28 = arith.constant 0 : index
    %c251 = arith.constant 251 : index
    %30 = vector.load %arg6[%c0_28, %c251] : memref<4x326xf32, #tpu.memory_space<vmem>>, vector<4x2xf32>
    tpu.vector_store %arg6[%c0_28, %c251], %29 {strides = array<i32>} : memref<4x326xf32, #tpu.memory_space<vmem>>, vector<4x2xf32>,
    %cst_29 = arith.constant 0.000000e+00 : f32
    %31 = vector.broadcast %cst_29 : f32 to vector<4x2xf32>
    %c0_30 = arith.constant 0 : index
    %c269 = arith.constant 269 : index
    %32 = vector.load %arg6[%c0_30, %c269] : memref<4x326xf32, #tpu.memory_space<vmem>>, vector<4x2xf32>
    tpu.vector_store %arg6[%c0_30, %c269], %31 {strides = array<i32>} : memref<4x326xf32, #tpu.memory_space<vmem>>, vector<4x2xf32>,
    %cst_31 = arith.constant 0.000000e+00 : f32
    %33 = vector.broadcast %cst_31 : f32 to vector<4x2xf32>
    %c0_32 = arith.constant 0 : index
    %c287 = arith.constant 287 : index
    %34 = vector.load %arg6[%c0_32, %c287] : memref<4x326xf32, #tpu.memory_space<vmem>>, vector<4x2xf32>
    tpu.vector_store %arg6[%c0_32, %c287], %33 {strides = array<i32>} : memref<4x326xf32, #tpu.memory_space<vmem>>, vector<4x2xf32>,
    %cst_33 = arith.constant 0.000000e+00 : f32
    %35 = vector.broadcast %cst_33 : f32 to vector<4x2xf32>
    %c0_34 = arith.constant 0 : index
    %c305 = arith.constant 305 : index
    %36 = vector.load %arg6[%c0_34, %c305] : memref<4x326xf32, #tpu.memory_space<vmem>>, vector<4x2xf32>
    tpu.vector_store %arg6[%c0_34, %c305], %35 {strides = array<i32>} : memref<4x326xf32, #tpu.memory_space<vmem>>, vector<4x2xf32>,
    %cst_35 = arith.constant 0.000000e+00 : f32
    %37 = vector.broadcast %cst_35 : f32 to vector<4x3xf32>
    %c0_36 = arith.constant 0 : index
    %c323 = arith.constant 323 : index
    %38 = vector.load %arg6[%c0_36, %c323] : memref<4x326xf32, #tpu.memory_space<vmem>>, vector<4x3xf32>
    tpu.vector_store %arg6[%c0_36, %c323], %37 {strides = array<i32>} : memref<4x326xf32, #tpu.memory_space<vmem>>, vector<4x3xf32>,
    %c-1_i32 = arith.constant -1 : i32
    %39 = arith.addi %0, %c-1_i32 : i32
    %c0_i32 = arith.constant 0 : i32
    %40 = arith.cmpi sge, %39, %c0_i32 : i32
    %c16_i32_37 = arith.constant 16 : i32
    %41 = arith.cmpi slt, %39, %c16_i32_37 : i32
    %42 = arith.andi %40, %41 : i1
    %c0_i32_38 = arith.constant 0 : i32
    %c15_i32 = arith.constant 15 : i32
    %43 = arith.maxsi %c0_i32_38, %39 : i32
    %44 = arith.minsi %c15_i32, %43 : i32
    %c0_39 = arith.constant 0 : index
    %c0_40 = arith.constant 0 : index
    %45 = arith.index_cast %44 : i32 to index
    %c0_41 = arith.constant 0 : index
    %46 = vector.load %arg2[%c0_39, %c0_40, %45, %c0_41] : memref<1x4x16x16xf32, #tpu.memory_space<vmem>>, vector<1x4x1x16xf32>
    %47 = vector.shape_cast %46 : vector<1x4x1x16xf32> to vector<4x1x16xf32>
    %48 = vector.shape_cast %47 : vector<4x1x16xf32> to vector<4x16xf32>
    %cst_42 = arith.constant 0.000000e+00 : f32
    %49 = vector.broadcast %cst_42 : f32 to vector<4x16xf32>
    %50 = arith.select %42, %48, %49 : vector<4x16xf32>
    %c0_43 = arith.constant 0 : index
    %c1 = arith.constant 1 : index
    %51 = vector.load %arg6[%c0_43, %c1] : memref<4x326xf32, #tpu.memory_space<vmem>>, vector<4x16xf32>
    tpu.vector_store %arg6[%c0_43, %c1], %50 {strides = array<i32>} : memref<4x326xf32, #tpu.memory_space<vmem>>, vector<4x16xf32>,
    %c0_i32_44 = arith.constant 0 : i32
    %52 = arith.addi %0, %c0_i32_44 : i32
    %c0_i32_45 = arith.constant 0 : i32
    %53 = arith.cmpi sge, %52, %c0_i32_45 : i32
    %c16_i32_46 = arith.constant 16 : i32
    %54 = arith.cmpi slt, %52, %c16_i32_46 : i32
    %55 = arith.andi %53, %54 : i1
    %c0_i32_47 = arith.constant 0 : i32
    %c15_i32_48 = arith.constant 15 : i32
    %56 = arith.maxsi %c0_i32_47, %52 : i32
    %57 = arith.minsi %c15_i32_48, %56 : i32
    %c0_49 = arith.constant 0 : index
    %c0_50 = arith.constant 0 : index
    %58 = arith.index_cast %57 : i32 to index
    %c0_51 = arith.constant 0 : index
    %59 = vector.load %arg2[%c0_49, %c0_50, %58, %c0_51] : memref<1x4x16x16xf32, #tpu.memory_space<vmem>>, vector<1x4x1x16xf32>
    %60 = vector.shape_cast %59 : vector<1x4x1x16xf32> to vector<4x1x16xf32>
    %61 = vector.shape_cast %60 : vector<4x1x16xf32> to vector<4x16xf32>
    %cst_52 = arith.constant 0.000000e+00 : f32
    %62 = vector.broadcast %cst_52 : f32 to vector<4x16xf32>
    %63 = arith.select %55, %61, %62 : vector<4x16xf32>
    %c0_53 = arith.constant 0 : index
    %c19 = arith.constant 19 : index
    %64 = vector.load %arg6[%c0_53, %c19] : memref<4x326xf32, #tpu.memory_space<vmem>>, vector<4x16xf32>
    tpu.vector_store %arg6[%c0_53, %c19], %63 {strides = array<i32>} : memref<4x326xf32, #tpu.memory_space<vmem>>, vector<4x16xf32>,
    %c1_i32 = arith.constant 1 : i32
    %65 = arith.addi %0, %c1_i32 : i32
    %c0_i32_54 = arith.constant 0 : i32
    %66 = arith.cmpi sge, %65, %c0_i32_54 : i32
    %c16_i32_55 = arith.constant 16 : i32
    %67 = arith.cmpi slt, %65, %c16_i32_55 : i32
    %68 = arith.andi %66, %67 : i1
    %c0_i32_56 = arith.constant 0 : i32
    %c15_i32_57 = arith.constant 15 : i32
    %69 = arith.maxsi %c0_i32_56, %65 : i32
    %70 = arith.minsi %c15_i32_57, %69 : i32
    %c0_58 = arith.constant 0 : index
    %c0_59 = arith.constant 0 : index
    %71 = arith.index_cast %70 : i32 to index
    %c0_60 = arith.constant 0 : index
    %72 = vector.load %arg2[%c0_58, %c0_59, %71, %c0_60] : memref<1x4x16x16xf32, #tpu.memory_space<vmem>>, vector<1x4x1x16xf32>
    %73 = vector.shape_cast %72 : vector<1x4x1x16xf32> to vector<4x1x16xf32>
    %74 = vector.shape_cast %73 : vector<4x1x16xf32> to vector<4x16xf32>
    %cst_61 = arith.constant 0.000000e+00 : f32
    %75 = vector.broadcast %cst_61 : f32 to vector<4x16xf32>
    %76 = arith.select %68, %74, %75 : vector<4x16xf32>
    %c0_62 = arith.constant 0 : index
    %c37 = arith.constant 37 : index
    %77 = vector.load %arg6[%c0_62, %c37] : memref<4x326xf32, #tpu.memory_space<vmem>>, vector<4x16xf32>
    tpu.vector_store %arg6[%c0_62, %c37], %76 {strides = array<i32>} : memref<4x326xf32, #tpu.memory_space<vmem>>, vector<4x16xf32>,
    %c2_i32 = arith.constant 2 : i32
    %78 = arith.addi %0, %c2_i32 : i32
    %c0_i32_63 = arith.constant 0 : i32
    %79 = arith.cmpi sge, %78, %c0_i32_63 : i32
    %c16_i32_64 = arith.constant 16 : i32
    %80 = arith.cmpi slt, %78, %c16_i32_64 : i32
    %81 = arith.andi %79, %80 : i1
    %c0_i32_65 = arith.constant 0 : i32
    %c15_i32_66 = arith.constant 15 : i32
    %82 = arith.maxsi %c0_i32_65, %78 : i32
    %83 = arith.minsi %c15_i32_66, %82 : i32
    %c0_67 = arith.constant 0 : index
    %c0_68 = arith.constant 0 : index
    %84 = arith.index_cast %83 : i32 to index
    %c0_69 = arith.constant 0 : index
    %85 = vector.load %arg2[%c0_67, %c0_68, %84, %c0_69] : memref<1x4x16x16xf32, #tpu.memory_space<vmem>>, vector<1x4x1x16xf32>
    %86 = vector.shape_cast %85 : vector<1x4x1x16xf32> to vector<4x1x16xf32>
    %87 = vector.shape_cast %86 : vector<4x1x16xf32> to vector<4x16xf32>
    %cst_70 = arith.constant 0.000000e+00 : f32
    %88 = vector.broadcast %cst_70 : f32 to vector<4x16xf32>
    %89 = arith.select %81, %87, %88 : vector<4x16xf32>
    %c0_71 = arith.constant 0 : index
    %c55 = arith.constant 55 : index
    %90 = vector.load %arg6[%c0_71, %c55] : memref<4x326xf32, #tpu.memory_space<vmem>>, vector<4x16xf32>
    tpu.vector_store %arg6[%c0_71, %c55], %89 {strides = array<i32>} : memref<4x326xf32, #tpu.memory_space<vmem>>, vector<4x16xf32>,
    %c3_i32 = arith.constant 3 : i32
    %91 = arith.addi %0, %c3_i32 : i32
    %c0_i32_72 = arith.constant 0 : i32
    %92 = arith.cmpi sge, %91, %c0_i32_72 : i32
    %c16_i32_73 = arith.constant 16 : i32
    %93 = arith.cmpi slt, %91, %c16_i32_73 : i32
    %94 = arith.andi %92, %93 : i1
    %c0_i32_74 = arith.constant 0 : i32
    %c15_i32_75 = arith.constant 15 : i32
    %95 = arith.maxsi %c0_i32_74, %91 : i32
    %96 = arith.minsi %c15_i32_75, %95 : i32
    %c0_76 = arith.constant 0 : index
    %c0_77 = arith.constant 0 : index
    %97 = arith.index_cast %96 : i32 to index
    %c0_78 = arith.constant 0 : index
    %98 = vector.load %arg2[%c0_76, %c0_77, %97, %c0_78] : memref<1x4x16x16xf32, #tpu.memory_space<vmem>>, vector<1x4x1x16xf32>
    %99 = vector.shape_cast %98 : vector<1x4x1x16xf32> to vector<4x1x16xf32>
    %100 = vector.shape_cast %99 : vector<4x1x16xf32> to vector<4x16xf32>
    %cst_79 = arith.constant 0.000000e+00 : f32
    %101 = vector.broadcast %cst_79 : f32 to vector<4x16xf32>
    %102 = arith.select %94, %100, %101 : vector<4x16xf32>
    %c0_80 = arith.constant 0 : index
    %c73 = arith.constant 73 : index
    %103 = vector.load %arg6[%c0_80, %c73] : memref<4x326xf32, #tpu.memory_space<vmem>>, vector<4x16xf32>
    tpu.vector_store %arg6[%c0_80, %c73], %102 {strides = array<i32>} : memref<4x326xf32, #tpu.memory_space<vmem>>, vector<4x16xf32>,
    %c4_i32 = arith.constant 4 : i32
    %104 = arith.addi %0, %c4_i32 : i32
    %c0_i32_81 = arith.constant 0 : i32
    %105 = arith.cmpi sge, %104, %c0_i32_81 : i32
    %c16_i32_82 = arith.constant 16 : i32
    %106 = arith.cmpi slt, %104, %c16_i32_82 : i32
    %107 = arith.andi %105, %106 : i1
    %c0_i32_83 = arith.constant 0 : i32
    %c15_i32_84 = arith.constant 15 : i32
    %108 = arith.maxsi %c0_i32_83, %104 : i32
    %109 = arith.minsi %c15_i32_84, %108 : i32
    %c0_85 = arith.constant 0 : index
    %c0_86 = arith.constant 0 : index
    %110 = arith.index_cast %109 : i32 to index
    %c0_87 = arith.constant 0 : index
    %111 = vector.load %arg2[%c0_85, %c0_86, %110, %c0_87] : memref<1x4x16x16xf32, #tpu.memory_space<vmem>>, vector<1x4x1x16xf32>
    %112 = vector.shape_cast %111 : vector<1x4x1x16xf32> to vector<4x1x16xf32>
    %113 = vector.shape_cast %112 : vector<4x1x16xf32> to vector<4x16xf32>
    %cst_88 = arith.constant 0.000000e+00 : f32
    %114 = vector.broadcast %cst_88 : f32 to vector<4x16xf32>
    %115 = arith.select %107, %113, %114 : vector<4x16xf32>
    %c0_89 = arith.constant 0 : index
    %c91 = arith.constant 91 : index
    %116 = vector.load %arg6[%c0_89, %c91] : memref<4x326xf32, #tpu.memory_space<vmem>>, vector<4x16xf32>
    tpu.vector_store %arg6[%c0_89, %c91], %115 {strides = array<i32>} : memref<4x326xf32, #tpu.memory_space<vmem>>, vector<4x16xf32>,
    %c5_i32 = arith.constant 5 : i32
    %117 = arith.addi %0, %c5_i32 : i32
    %c0_i32_90 = arith.constant 0 : i32
    %118 = arith.cmpi sge, %117, %c0_i32_90 : i32
    %c16_i32_91 = arith.constant 16 : i32
    %119 = arith.cmpi slt, %117, %c16_i32_91 : i32
    %120 = arith.andi %118, %119 : i1
    %c0_i32_92 = arith.constant 0 : i32
    %c15_i32_93 = arith.constant 15 : i32
    %121 = arith.maxsi %c0_i32_92, %117 : i32
    %122 = arith.minsi %c15_i32_93, %121 : i32
    %c0_94 = arith.constant 0 : index
    %c0_95 = arith.constant 0 : index
    %123 = arith.index_cast %122 : i32 to index
    %c0_96 = arith.constant 0 : index
    %124 = vector.load %arg2[%c0_94, %c0_95, %123, %c0_96] : memref<1x4x16x16xf32, #tpu.memory_space<vmem>>, vector<1x4x1x16xf32>
    %125 = vector.shape_cast %124 : vector<1x4x1x16xf32> to vector<4x1x16xf32>
    %126 = vector.shape_cast %125 : vector<4x1x16xf32> to vector<4x16xf32>
    %cst_97 = arith.constant 0.000000e+00 : f32
    %127 = vector.broadcast %cst_97 : f32 to vector<4x16xf32>
    %128 = arith.select %120, %126, %127 : vector<4x16xf32>
    %c0_98 = arith.constant 0 : index
    %c109 = arith.constant 109 : index
    %129 = vector.load %arg6[%c0_98, %c109] : memref<4x326xf32, #tpu.memory_space<vmem>>, vector<4x16xf32>
    tpu.vector_store %arg6[%c0_98, %c109], %128 {strides = array<i32>} : memref<4x326xf32, #tpu.memory_space<vmem>>, vector<4x16xf32>,
    %c6_i32 = arith.constant 6 : i32
    %130 = arith.addi %0, %c6_i32 : i32
    %c0_i32_99 = arith.constant 0 : i32
    %131 = arith.cmpi sge, %130, %c0_i32_99 : i32
    %c16_i32_100 = arith.constant 16 : i32
    %132 = arith.cmpi slt, %130, %c16_i32_100 : i32
    %133 = arith.andi %131, %132 : i1
    %c0_i32_101 = arith.constant 0 : i32
    %c15_i32_102 = arith.constant 15 : i32
    %134 = arith.maxsi %c0_i32_101, %130 : i32
    %135 = arith.minsi %c15_i32_102, %134 : i32
    %c0_103 = arith.constant 0 : index
    %c0_104 = arith.constant 0 : index
    %136 = arith.index_cast %135 : i32 to index
    %c0_105 = arith.constant 0 : index
    %137 = vector.load %arg2[%c0_103, %c0_104, %136, %c0_105] : memref<1x4x16x16xf32, #tpu.memory_space<vmem>>, vector<1x4x1x16xf32>
    %138 = vector.shape_cast %137 : vector<1x4x1x16xf32> to vector<4x1x16xf32>
    %139 = vector.shape_cast %138 : vector<4x1x16xf32> to vector<4x16xf32>
    %cst_106 = arith.constant 0.000000e+00 : f32
    %140 = vector.broadcast %cst_106 : f32 to vector<4x16xf32>
    %141 = arith.select %133, %139, %140 : vector<4x16xf32>
    %c0_107 = arith.constant 0 : index
    %c127 = arith.constant 127 : index
    %142 = vector.load %arg6[%c0_107, %c127] : memref<4x326xf32, #tpu.memory_space<vmem>>, vector<4x16xf32>
    tpu.vector_store %arg6[%c0_107, %c127], %141 {strides = array<i32>} : memref<4x326xf32, #tpu.memory_space<vmem>>, vector<4x16xf32>,
    %c7_i32 = arith.constant 7 : i32
    %143 = arith.addi %0, %c7_i32 : i32
    %c0_i32_108 = arith.constant 0 : i32
    %144 = arith.cmpi sge, %143, %c0_i32_108 : i32
    %c16_i32_109 = arith.constant 16 : i32
    %145 = arith.cmpi slt, %143, %c16_i32_109 : i32
    %146 = arith.andi %144, %145 : i1
    %c0_i32_110 = arith.constant 0 : i32
    %c15_i32_111 = arith.constant 15 : i32
    %147 = arith.maxsi %c0_i32_110, %143 : i32
    %148 = arith.minsi %c15_i32_111, %147 : i32
    %c0_112 = arith.constant 0 : index
    %c0_113 = arith.constant 0 : index
    %149 = arith.index_cast %148 : i32 to index
    %c0_114 = arith.constant 0 : index
    %150 = vector.load %arg2[%c0_112, %c0_113, %149, %c0_114] : memref<1x4x16x16xf32, #tpu.memory_space<vmem>>, vector<1x4x1x16xf32>
    %151 = vector.shape_cast %150 : vector<1x4x1x16xf32> to vector<4x1x16xf32>
    %152 = vector.shape_cast %151 : vector<4x1x16xf32> to vector<4x16xf32>
    %cst_115 = arith.constant 0.000000e+00 : f32
    %153 = vector.broadcast %cst_115 : f32 to vector<4x16xf32>
    %154 = arith.select %146, %152, %153 : vector<4x16xf32>
    %c0_116 = arith.constant 0 : index
    %c145 = arith.constant 145 : index
    %155 = vector.load %arg6[%c0_116, %c145] : memref<4x326xf32, #tpu.memory_space<vmem>>, vector<4x16xf32>
    tpu.vector_store %arg6[%c0_116, %c145], %154 {strides = array<i32>} : memref<4x326xf32, #tpu.memory_space<vmem>>, vector<4x16xf32>,
    %c8_i32 = arith.constant 8 : i32
    %156 = arith.addi %0, %c8_i32 : i32
    %c0_i32_117 = arith.constant 0 : i32
    %157 = arith.cmpi sge, %156, %c0_i32_117 : i32
    %c16_i32_118 = arith.constant 16 : i32
    %158 = arith.cmpi slt, %156, %c16_i32_118 : i32
    %159 = arith.andi %157, %158 : i1
    %c0_i32_119 = arith.constant 0 : i32
    %c15_i32_120 = arith.constant 15 : i32
    %160 = arith.maxsi %c0_i32_119, %156 : i32
    %161 = arith.minsi %c15_i32_120, %160 : i32
    %c0_121 = arith.constant 0 : index
    %c0_122 = arith.constant 0 : index
    %162 = arith.index_cast %161 : i32 to index
    %c0_123 = arith.constant 0 : index
    %163 = vector.load %arg2[%c0_121, %c0_122, %162, %c0_123] : memref<1x4x16x16xf32, #tpu.memory_space<vmem>>, vector<1x4x1x16xf32>
    %164 = vector.shape_cast %163 : vector<1x4x1x16xf32> to vector<4x1x16xf32>
    %165 = vector.shape_cast %164 : vector<4x1x16xf32> to vector<4x16xf32>
    %cst_124 = arith.constant 0.000000e+00 : f32
    %166 = vector.broadcast %cst_124 : f32 to vector<4x16xf32>
    %167 = arith.select %159, %165, %166 : vector<4x16xf32>
    %c0_125 = arith.constant 0 : index
    %c163 = arith.constant 163 : index
    %168 = vector.load %arg6[%c0_125, %c163] : memref<4x326xf32, #tpu.memory_space<vmem>>, vector<4x16xf32>
    tpu.vector_store %arg6[%c0_125, %c163], %167 {strides = array<i32>} : memref<4x326xf32, #tpu.memory_space<vmem>>, vector<4x16xf32>,
    %c9_i32 = arith.constant 9 : i32
    %169 = arith.addi %0, %c9_i32 : i32
    %c0_i32_126 = arith.constant 0 : i32
    %170 = arith.cmpi sge, %169, %c0_i32_126 : i32
    %c16_i32_127 = arith.constant 16 : i32
    %171 = arith.cmpi slt, %169, %c16_i32_127 : i32
    %172 = arith.andi %170, %171 : i1
    %c0_i32_128 = arith.constant 0 : i32
    %c15_i32_129 = arith.constant 15 : i32
    %173 = arith.maxsi %c0_i32_128, %169 : i32
    %174 = arith.minsi %c15_i32_129, %173 : i32
    %c0_130 = arith.constant 0 : index
    %c0_131 = arith.constant 0 : index
    %175 = arith.index_cast %174 : i32 to index
    %c0_132 = arith.constant 0 : index
    %176 = vector.load %arg2[%c0_130, %c0_131, %175, %c0_132] : memref<1x4x16x16xf32, #tpu.memory_space<vmem>>, vector<1x4x1x16xf32>
    %177 = vector.shape_cast %176 : vector<1x4x1x16xf32> to vector<4x1x16xf32>
    %178 = vector.shape_cast %177 : vector<4x1x16xf32> to vector<4x16xf32>
    %cst_133 = arith.constant 0.000000e+00 : f32
    %179 = vector.broadcast %cst_133 : f32 to vector<4x16xf32>
    %180 = arith.select %172, %178, %179 : vector<4x16xf32>
    %c0_134 = arith.constant 0 : index
    %c181 = arith.constant 181 : index
    %181 = vector.load %arg6[%c0_134, %c181] : memref<4x326xf32, #tpu.memory_space<vmem>>, vector<4x16xf32>
    tpu.vector_store %arg6[%c0_134, %c181], %180 {strides = array<i32>} : memref<4x326xf32, #tpu.memory_space<vmem>>, vector<4x16xf32>,
    %c10_i32 = arith.constant 10 : i32
    %182 = arith.addi %0, %c10_i32 : i32
    %c0_i32_135 = arith.constant 0 : i32
    %183 = arith.cmpi sge, %182, %c0_i32_135 : i32
    %c16_i32_136 = arith.constant 16 : i32
    %184 = arith.cmpi slt, %182, %c16_i32_136 : i32
    %185 = arith.andi %183, %184 : i1
    %c0_i32_137 = arith.constant 0 : i32
    %c15_i32_138 = arith.constant 15 : i32
    %186 = arith.maxsi %c0_i32_137, %182 : i32
    %187 = arith.minsi %c15_i32_138, %186 : i32
    %c0_139 = arith.constant 0 : index
    %c0_140 = arith.constant 0 : index
    %188 = arith.index_cast %187 : i32 to index
    %c0_141 = arith.constant 0 : index
    %189 = vector.load %arg2[%c0_139, %c0_140, %188, %c0_141] : memref<1x4x16x16xf32, #tpu.memory_space<vmem>>, vector<1x4x1x16xf32>
    %190 = vector.shape_cast %189 : vector<1x4x1x16xf32> to vector<4x1x16xf32>
    %191 = vector.shape_cast %190 : vector<4x1x16xf32> to vector<4x16xf32>
    %cst_142 = arith.constant 0.000000e+00 : f32
    %192 = vector.broadcast %cst_142 : f32 to vector<4x16xf32>
    %193 = arith.select %185, %191, %192 : vector<4x16xf32>
    %c0_143 = arith.constant 0 : index
    %c199 = arith.constant 199 : index
    %194 = vector.load %arg6[%c0_143, %c199] : memref<4x326xf32, #tpu.memory_space<vmem>>, vector<4x16xf32>
    tpu.vector_store %arg6[%c0_143, %c199], %193 {strides = array<i32>} : memref<4x326xf32, #tpu.memory_space<vmem>>, vector<4x16xf32>,
    %c11_i32 = arith.constant 11 : i32
    %195 = arith.addi %0, %c11_i32 : i32
    %c0_i32_144 = arith.constant 0 : i32
    %196 = arith.cmpi sge, %195, %c0_i32_144 : i32
    %c16_i32_145 = arith.constant 16 : i32
    %197 = arith.cmpi slt, %195, %c16_i32_145 : i32
    %198 = arith.andi %196, %197 : i1
    %c0_i32_146 = arith.constant 0 : i32
    %c15_i32_147 = arith.constant 15 : i32
    %199 = arith.maxsi %c0_i32_146, %195 : i32
    %200 = arith.minsi %c15_i32_147, %199 : i32
    %c0_148 = arith.constant 0 : index
    %c0_149 = arith.constant 0 : index
    %201 = arith.index_cast %200 : i32 to index
    %c0_150 = arith.constant 0 : index
    %202 = vector.load %arg2[%c0_148, %c0_149, %201, %c0_150] : memref<1x4x16x16xf32, #tpu.memory_space<vmem>>, vector<1x4x1x16xf32>
    %203 = vector.shape_cast %202 : vector<1x4x1x16xf32> to vector<4x1x16xf32>
    %204 = vector.shape_cast %203 : vector<4x1x16xf32> to vector<4x16xf32>
    %cst_151 = arith.constant 0.000000e+00 : f32
    %205 = vector.broadcast %cst_151 : f32 to vector<4x16xf32>
    %206 = arith.select %198, %204, %205 : vector<4x16xf32>
    %c0_152 = arith.constant 0 : index
    %c217 = arith.constant 217 : index
    %207 = vector.load %arg6[%c0_152, %c217] : memref<4x326xf32, #tpu.memory_space<vmem>>, vector<4x16xf32>
    tpu.vector_store %arg6[%c0_152, %c217], %206 {strides = array<i32>} : memref<4x326xf32, #tpu.memory_space<vmem>>, vector<4x16xf32>,
    %c12_i32 = arith.constant 12 : i32
    %208 = arith.addi %0, %c12_i32 : i32
    %c0_i32_153 = arith.constant 0 : i32
    %209 = arith.cmpi sge, %208, %c0_i32_153 : i32
    %c16_i32_154 = arith.constant 16 : i32
    %210 = arith.cmpi slt, %208, %c16_i32_154 : i32
    %211 = arith.andi %209, %210 : i1
    %c0_i32_155 = arith.constant 0 : i32
    %c15_i32_156 = arith.constant 15 : i32
    %212 = arith.maxsi %c0_i32_155, %208 : i32
    %213 = arith.minsi %c15_i32_156, %212 : i32
    %c0_157 = arith.constant 0 : index
    %c0_158 = arith.constant 0 : index
    %214 = arith.index_cast %213 : i32 to index
    %c0_159 = arith.constant 0 : index
    %215 = vector.load %arg2[%c0_157, %c0_158, %214, %c0_159] : memref<1x4x16x16xf32, #tpu.memory_space<vmem>>, vector<1x4x1x16xf32>
    %216 = vector.shape_cast %215 : vector<1x4x1x16xf32> to vector<4x1x16xf32>
    %217 = vector.shape_cast %216 : vector<4x1x16xf32> to vector<4x16xf32>
    %cst_160 = arith.constant 0.000000e+00 : f32
    %218 = vector.broadcast %cst_160 : f32 to vector<4x16xf32>
    %219 = arith.select %211, %217, %218 : vector<4x16xf32>
    %c0_161 = arith.constant 0 : index
    %c235 = arith.constant 235 : index
    %220 = vector.load %arg6[%c0_161, %c235] : memref<4x326xf32, #tpu.memory_space<vmem>>, vector<4x16xf32>
    tpu.vector_store %arg6[%c0_161, %c235], %219 {strides = array<i32>} : memref<4x326xf32, #tpu.memory_space<vmem>>, vector<4x16xf32>,
    %c13_i32 = arith.constant 13 : i32
    %221 = arith.addi %0, %c13_i32 : i32
    %c0_i32_162 = arith.constant 0 : i32
    %222 = arith.cmpi sge, %221, %c0_i32_162 : i32
    %c16_i32_163 = arith.constant 16 : i32
    %223 = arith.cmpi slt, %221, %c16_i32_163 : i32
    %224 = arith.andi %222, %223 : i1
    %c0_i32_164 = arith.constant 0 : i32
    %c15_i32_165 = arith.constant 15 : i32
    %225 = arith.maxsi %c0_i32_164, %221 : i32
    %226 = arith.minsi %c15_i32_165, %225 : i32
    %c0_166 = arith.constant 0 : index
    %c0_167 = arith.constant 0 : index
    %227 = arith.index_cast %226 : i32 to index
    %c0_168 = arith.constant 0 : index
    %228 = vector.load %arg2[%c0_166, %c0_167, %227, %c0_168] : memref<1x4x16x16xf32, #tpu.memory_space<vmem>>, vector<1x4x1x16xf32>
    %229 = vector.shape_cast %228 : vector<1x4x1x16xf32> to vector<4x1x16xf32>
    %230 = vector.shape_cast %229 : vector<4x1x16xf32> to vector<4x16xf32>
    %cst_169 = arith.constant 0.000000e+00 : f32
    %231 = vector.broadcast %cst_169 : f32 to vector<4x16xf32>
    %232 = arith.select %224, %230, %231 : vector<4x16xf32>
    %c0_170 = arith.constant 0 : index
    %c253 = arith.constant 253 : index
    %233 = vector.load %arg6[%c0_170, %c253] : memref<4x326xf32, #tpu.memory_space<vmem>>, vector<4x16xf32>
    tpu.vector_store %arg6[%c0_170, %c253], %232 {strides = array<i32>} : memref<4x326xf32, #tpu.memory_space<vmem>>, vector<4x16xf32>,
    %c14_i32 = arith.constant 14 : i32
    %234 = arith.addi %0, %c14_i32 : i32
    %c0_i32_171 = arith.constant 0 : i32
    %235 = arith.cmpi sge, %234, %c0_i32_171 : i32
    %c16_i32_172 = arith.constant 16 : i32
    %236 = arith.cmpi slt, %234, %c16_i32_172 : i32
    %237 = arith.andi %235, %236 : i1
    %c0_i32_173 = arith.constant 0 : i32
    %c15_i32_174 = arith.constant 15 : i32
    %238 = arith.maxsi %c0_i32_173, %234 : i32
    %239 = arith.minsi %c15_i32_174, %238 : i32
    %c0_175 = arith.constant 0 : index
    %c0_176 = arith.constant 0 : index
    %240 = arith.index_cast %239 : i32 to index
    %c0_177 = arith.constant 0 : index
    %241 = vector.load %arg2[%c0_175, %c0_176, %240, %c0_177] : memref<1x4x16x16xf32, #tpu.memory_space<vmem>>, vector<1x4x1x16xf32>
    %242 = vector.shape_cast %241 : vector<1x4x1x16xf32> to vector<4x1x16xf32>
    %243 = vector.shape_cast %242 : vector<4x1x16xf32> to vector<4x16xf32>
    %cst_178 = arith.constant 0.000000e+00 : f32
    %244 = vector.broadcast %cst_178 : f32 to vector<4x16xf32>
    %245 = arith.select %237, %243, %244 : vector<4x16xf32>
    %c0_179 = arith.constant 0 : index
    %c271 = arith.constant 271 : index
    %246 = vector.load %arg6[%c0_179, %c271] : memref<4x326xf32, #tpu.memory_space<vmem>>, vector<4x16xf32>
    tpu.vector_store %arg6[%c0_179, %c271], %245 {strides = array<i32>} : memref<4x326xf32, #tpu.memory_space<vmem>>, vector<4x16xf32>,
    %c15_i32_180 = arith.constant 15 : i32
    %247 = arith.addi %0, %c15_i32_180 : i32
    %c0_i32_181 = arith.constant 0 : i32
    %248 = arith.cmpi sge, %247, %c0_i32_181 : i32
    %c16_i32_182 = arith.constant 16 : i32
    %249 = arith.cmpi slt, %247, %c16_i32_182 : i32
    %250 = arith.andi %248, %249 : i1
    %c0_i32_183 = arith.constant 0 : i32
    %c15_i32_184 = arith.constant 15 : i32
    %251 = arith.maxsi %c0_i32_183, %247 : i32
    %252 = arith.minsi %c15_i32_184, %251 : i32
    %c0_185 = arith.constant 0 : index
    %c0_186 = arith.constant 0 : index
    %253 = arith.index_cast %252 : i32 to index
    %c0_187 = arith.constant 0 : index
    %254 = vector.load %arg2[%c0_185, %c0_186, %253, %c0_187] : memref<1x4x16x16xf32, #tpu.memory_space<vmem>>, vector<1x4x1x16xf32>
    %255 = vector.shape_cast %254 : vector<1x4x1x16xf32> to vector<4x1x16xf32>
    %256 = vector.shape_cast %255 : vector<4x1x16xf32> to vector<4x16xf32>
    %cst_188 = arith.constant 0.000000e+00 : f32
    %257 = vector.broadcast %cst_188 : f32 to vector<4x16xf32>
    %258 = arith.select %250, %256, %257 : vector<4x16xf32>
    %c0_189 = arith.constant 0 : index
    %c289 = arith.constant 289 : index
    %259 = vector.load %arg6[%c0_189, %c289] : memref<4x326xf32, #tpu.memory_space<vmem>>, vector<4x16xf32>
    tpu.vector_store %arg6[%c0_189, %c289], %258 {strides = array<i32>} : memref<4x326xf32, #tpu.memory_space<vmem>>, vector<4x16xf32>,
    %c16_i32_190 = arith.constant 16 : i32
    %260 = arith.addi %0, %c16_i32_190 : i32
    %c0_i32_191 = arith.constant 0 : i32
    %261 = arith.cmpi sge, %260, %c0_i32_191 : i32
    %c16_i32_192 = arith.constant 16 : i32
    %262 = arith.cmpi slt, %260, %c16_i32_192 : i32
    %263 = arith.andi %261, %262 : i1
    %c0_i32_193 = arith.constant 0 : i32
    %c15_i32_194 = arith.constant 15 : i32
    %264 = arith.maxsi %c0_i32_193, %260 : i32
    %265 = arith.minsi %c15_i32_194, %264 : i32
    %c0_195 = arith.constant 0 : index
    %c0_196 = arith.constant 0 : index
    %266 = arith.index_cast %265 : i32 to index
    %c0_197 = arith.constant 0 : index
    %267 = vector.load %arg2[%c0_195, %c0_196, %266, %c0_197] : memref<1x4x16x16xf32, #tpu.memory_space<vmem>>, vector<1x4x1x16xf32>
    %268 = vector.shape_cast %267 : vector<1x4x1x16xf32> to vector<4x1x16xf32>
    %269 = vector.shape_cast %268 : vector<4x1x16xf32> to vector<4x16xf32>
    %cst_198 = arith.constant 0.000000e+00 : f32
    %270 = vector.broadcast %cst_198 : f32 to vector<4x16xf32>
    %271 = arith.select %263, %269, %270 : vector<4x16xf32>
    %c0_199 = arith.constant 0 : index
    %c307 = arith.constant 307 : index
    %272 = vector.load %arg6[%c0_199, %c307] : memref<4x326xf32, #tpu.memory_space<vmem>>, vector<4x16xf32>
    tpu.vector_store %arg6[%c0_199, %c307], %271 {strides = array<i32>} : memref<4x326xf32, #tpu.memory_space<vmem>>, vector<4x16xf32>,
    %c0_200 = arith.constant 0 : index
    %c0_201 = arith.constant 0 : index
    %273 = vector.load %arg6[%c0_200, %c0_201] : memref<4x326xf32, #tpu.memory_space<vmem>>, vector<4x288xf32>
    %c0_202 = arith.constant 0 : index
    %c0_203 = arith.constant 0 : index
    %274 = vector.load %arg7[%c0_202, %c0_203] : memref<36x288xf32, #tpu.memory_space<vmem>>, vector<4x288xf32>
    tpu.vector_store %arg7[%c0_202, %c0_203], %273 {strides = array<i32>} : memref<36x288xf32, #tpu.memory_space<vmem>>, vector<4x288xf32>,
    %c0_204 = arith.constant 0 : index
    %c1_205 = arith.constant 1 : index
    %275 = vector.load %arg6[%c0_204, %c1_205] : memref<4x326xf32, #tpu.memory_space<vmem>>, vector<4x288xf32>
    %c4 = arith.constant 4 : index
    %c0_206 = arith.constant 0 : index
    %276 = vector.load %arg7[%c4, %c0_206] : memref<36x288xf32, #tpu.memory_space<vmem>>, vector<4x288xf32>
    tpu.vector_store %arg7[%c4, %c0_206], %275 {strides = array<i32>} : memref<36x288xf32, #tpu.memory_space<vmem>>, vector<4x288xf32>,
    %c0_207 = arith.constant 0 : index
    %c2 = arith.constant 2 : index
    %277 = vector.load %arg6[%c0_207, %c2] : memref<4x326xf32, #tpu.memory_space<vmem>>, vector<4x288xf32>
    %c8 = arith.constant 8 : index
    %c0_208 = arith.constant 0 : index
    %278 = vector.load %arg7[%c8, %c0_208] : memref<36x288xf32, #tpu.memory_space<vmem>>, vector<4x288xf32>
    tpu.vector_store %arg7[%c8, %c0_208], %277 {strides = array<i32>} : memref<36x288xf32, #tpu.memory_space<vmem>>, vector<4x288xf32>,
    %c0_209 = arith.constant 0 : index
    %c18 = arith.constant 18 : index
    %279 = vector.load %arg6[%c0_209, %c18] : memref<4x326xf32, #tpu.memory_space<vmem>>, vector<4x288xf32>
    %c12 = arith.constant 12 : index
    %c0_210 = arith.constant 0 : index
    %280 = vector.load %arg7[%c12, %c0_210] : memref<36x288xf32, #tpu.memory_space<vmem>>, vector<4x288xf32>
    tpu.vector_store %arg7[%c12, %c0_210], %279 {strides = array<i32>} : memref<36x288xf32, #tpu.memory_space<vmem>>, vector<4x288xf32>,
    %c0_211 = arith.constant 0 : index
    %c19_212 = arith.constant 19 : index
    %281 = vector.load %arg6[%c0_211, %c19_212] : memref<4x326xf32, #tpu.memory_space<vmem>>, vector<4x288xf32>
    %c16 = arith.constant 16 : index
    %c0_213 = arith.constant 0 : index
    %282 = vector.load %arg7[%c16, %c0_213] : memref<36x288xf32, #tpu.memory_space<vmem>>, vector<4x288xf32>
    tpu.vector_store %arg7[%c16, %c0_213], %281 {strides = array<i32>} : memref<36x288xf32, #tpu.memory_space<vmem>>, vector<4x288xf32>,
    %c0_214 = arith.constant 0 : index
    %c20 = arith.constant 20 : index
    %283 = vector.load %arg6[%c0_214, %c20] : memref<4x326xf32, #tpu.memory_space<vmem>>, vector<4x288xf32>
    %c20_215 = arith.constant 20 : index
    %c0_216 = arith.constant 0 : index
    %284 = vector.load %arg7[%c20_215, %c0_216] : memref<36x288xf32, #tpu.memory_space<vmem>>, vector<4x288xf32>
    tpu.vector_store %arg7[%c20_215, %c0_216], %283 {strides = array<i32>} : memref<36x288xf32, #tpu.memory_space<vmem>>, vector<4x288xf32>,
    %c0_217 = arith.constant 0 : index
    %c36 = arith.constant 36 : index
    %285 = vector.load %arg6[%c0_217, %c36] : memref<4x326xf32, #tpu.memory_space<vmem>>, vector<4x288xf32>
    %c24 = arith.constant 24 : index
    %c0_218 = arith.constant 0 : index
    %286 = vector.load %arg7[%c24, %c0_218] : memref<36x288xf32, #tpu.memory_space<vmem>>, vector<4x288xf32>
    tpu.vector_store %arg7[%c24, %c0_218], %285 {strides = array<i32>} : memref<36x288xf32, #tpu.memory_space<vmem>>, vector<4x288xf32>,
    %c0_219 = arith.constant 0 : index
    %c37_220 = arith.constant 37 : index
    %287 = vector.load %arg6[%c0_219, %c37_220] : memref<4x326xf32, #tpu.memory_space<vmem>>, vector<4x288xf32>
    %c28 = arith.constant 28 : index
    %c0_221 = arith.constant 0 : index
    %288 = vector.load %arg7[%c28, %c0_221] : memref<36x288xf32, #tpu.memory_space<vmem>>, vector<4x288xf32>
    tpu.vector_store %arg7[%c28, %c0_221], %287 {strides = array<i32>} : memref<36x288xf32, #tpu.memory_space<vmem>>, vector<4x288xf32>,
    %c0_222 = arith.constant 0 : index
    %c38 = arith.constant 38 : index
    %289 = vector.load %arg6[%c0_222, %c38] : memref<4x326xf32, #tpu.memory_space<vmem>>, vector<4x288xf32>
    %c32 = arith.constant 32 : index
    %c0_223 = arith.constant 0 : index
    %290 = vector.load %arg7[%c32, %c0_223] : memref<36x288xf32, #tpu.memory_space<vmem>>, vector<4x288xf32>
    tpu.vector_store %arg7[%c32, %c0_223], %289 {strides = array<i32>} : memref<36x288xf32, #tpu.memory_space<vmem>>, vector<4x288xf32>,
    %c0_224 = arith.constant 0 : index
    %c0_225 = arith.constant 0 : index
    %291 = vector.load %arg3[%c0_224, %c0_225] : memref<8x36xf32, #tpu.memory_space<vmem>>, vector<8x36xf32>
    %c0_226 = arith.constant 0 : index
    %c0_227 = arith.constant 0 : index
    %292 = vector.load %arg7[%c0_226, %c0_227] : memref<36x288xf32, #tpu.memory_space<vmem>>, vector<36x288xf32>
    %cst_228 = arith.constant dense<0.000000e+00> : vector<8x288xf32>
    %293 = tpu.matmul %291, %292, %cst_228 {dimension_numbers = #tpu.dot_dimension_numbers<[1], [0], [0], [1], [0, 0, 1, 1], [], []>} : vector<8x36xf32>, vector<36x288xf32>, vector<8x288xf32> -> vector<8x288xf32>
    %c0_229 = arith.constant 0 : index
    %c0_230 = arith.constant 0 : index
    %294 = vector.load %arg4[%c0_229, %c0_230] : memref<8x1xf32, #tpu.memory_space<vmem>>, vector<8x1xf32>
    %295 = vector.broadcast %294 : vector<8x1xf32> to vector<8x288xf32>
    %296 = arith.addf %293, %295 : vector<8x288xf32>
    %c0_231 = arith.constant 0 : index
    %c0_232 = arith.constant 0 : index
    %c0_233 = arith.constant 0 : index
    %297 = vector.load %arg5[%c0_231, %c0_232, %c0_233] : memref<1x8x288xf32, #tpu.memory_space<vmem>>, vector<1x8x288xf32>
    %298 = vector.shape_cast %297 : vector<1x8x288xf32> to vector<8x288xf32>
    %299 = vector.shape_cast %296 : vector<8x288xf32> to vector<1x8x288xf32>
    tpu.vector_store %arg5[%c0_231, %c0_232, %c0_233], %299 {strides = array<i32>} : memref<1x8x288xf32, #tpu.memory_space<vmem>>, vector<1x8x288xf32>,
    return
  }
  func.func @transform_0(%arg0: i32, %arg1: i32) -> (i32, i32, i32, i32) {
    %c0_i32 = arith.constant 0 : i32
    %c0_i32_0 = arith.constant 0 : i32
    %c0_i32_1 = arith.constant 0 : i32
    %c0_i32_2 = arith.constant 0 : i32
    return %arg0, %c0_i32, %c0_i32_0, %c0_i32_1 : i32, i32, i32, i32
  }
  func.func @transform_1(%arg0: i32, %arg1: i32) -> (i32, i32) {
    %c0_i32 = arith.constant 0 : i32
    %c0_i32_0 = arith.constant 0 : i32
    %c0_i32_1 = arith.constant 0 : i32
    return %c0_i32, %c0_i32_0 : i32, i32
  }
  func.func @transform_2(%arg0: i32, %arg1: i32) -> (i32, i32) {
    %c0_i32 = arith.constant 0 : i32
    %c0_i32_0 = arith.constant 0 : i32
    %c0_i32_1 = arith.constant 0 : i32
    return %c0_i32, %c0_i32_0 : i32, i32
  }
  func.func @transform_3(%arg0: i32, %arg1: i32) -> (i32, i32, i32) {
    %c0_i32 = arith.constant 0 : i32
    %c0_i32_0 = arith.constant 0 : i32
    return %arg0, %c0_i32, %arg1 : i32, i32, i32
  }
}

</mosaic_0001>

<bundles_post_ra>
// kernel: tpu_custom_call.1
= control target key start
LH: loop header
LB: loop body
LE: loop exit
PB: predicated region body
PF: predicated region fallthrough
CT: control target
= control target key end

     0   :  { %8 = vsyncpa [#allocation5], 0  ;;  %s2139_s0 = inlined_call_operand.hbm [shape: f32[2,4,16,16], index: 0, kind: input, shape index: {}]   ;;  %s2140_s1 = inlined_call_operand.vmem [shape: f32[8,36], index: 1, kind: input, shape index: {}]   ;;  %s2141_s2 = inlined_call_operand.vmem [shape: f32[8,1], index: 2, kind: input, shape index: {}]   ;;  %s2142_s3 = inlined_call_operand.hbm [shape: f32[2,8,288], index: 3, kind: output, shape index: {}]  }
   0x1   :  { %10 = vsyncpa [#allocation5 + $0x1], 0 }
   0x2   :  { %11 = vsyncpa [#allocation6], 0 }
   0x3   :  { %13 = vsyncpa [#allocation6 + $0x1], 0  ;;  %s1737_s12 = smov 0   ;;  %s1739_s13 = smov 0  }
   0x4   :  { %s1741_s14 = smov 0   ;;  %s1743_s15 = smov 0  }
   0x5   :  { %s1745_s16 = smov 0   ;;  %s1747_s17 = smov 0  }
   0x6 LB: > { %s1401_s18 = sadd.s32 4294967295, %s1688_s17   ;;  %s1402_s19 = sadd.s32 4294967294, %s1688_s17   ;;  %s1688_s17 = sphi %s1747_s17, %s19_s17   ;;  %s1684_s16 = sphi %s1745_s16, %s2151_s16   ;;  %s1680_s15 = sphi %s1743_s15, %s2150_s15   ;;  %s1676_s14 = sphi %s1741_s14, %s2149_s14   ;;  %s1672_s13 = sphi %s1739_s13, %s2148_s13   ;;  %s1668_s12 = sphi %s1737_s12, %s2147_s12  }
   0x7   : > { %s31_s20 = sadd.s32 1, %s1684_s16  ;;  %s38_s21 = sadd.s32 1, %s1676_s14 }
   0x8   : > { %p33_p0 = scmp.ge.s32.totalorder %s31_s20, 2  ;;  %p45_p1 = scmp.ne.s32.totalorder %s1676_s14, %s1672_s13 }
   0x9   : > { %p46_p2 = scmp.eq.s32.totalorder %s1688_s17, 0  ;;  %p51_p3 = scmp.ne.s32.totalorder %s1672_s13, %s1668_s12 }
   0xa   : > { %s2153_s20 = smov (%p33_p0, %s31_s20), 0  ;;  %p52_p5 = scmp.eq.s32.totalorder %s1401_s18, 0 }
   0xb   : > { %p1778_p4 = por %p46_p2, %p45_p1  ;;  %s35_s23 = ssub.s32 %s1684_s16, %s2153_s20 }
   0xc   : > { %p119_p6 = scmp.eq.s32.totalorder %s1401_s18, 1  ;;  %p36_p7 = scmp.eq.s32.totalorder %s35_s23, 0 }
   0xd   : > { %p1784_p8 = por %p52_p5, %p51_p3  ;;  %p125_p10 = scmp.eq.s32.totalorder %s1402_s19, 1 }
   0xe   : > { %p1788_p9 = por %p119_p6, %p45_p1  ;;  %p1404_p12 = scmp.ge.s32.totalorder %s1688_s17, 2 }
   0xf   : > { %s1793_s26 = scalar_select %p36_p7, %s1676_s14, %s38_s21  }
  0x10   : > { %p1795_p11 = por %p125_p10, %p51_p3  ;;  %p1498_p13 = scmp.lt.s32.totalorder %s1688_s17, 2 }
  0x11   : > { %s151_s28 = sand.u32 1, %s1676_s14   ;;  %s1483_s30 = sshll.u32 %s1684_s16, 6 }
  0x12   : > { %s1405_s29 = sshll.u32 %s151_s28, 6  ;;  %s160_s6 = scalar_lea.hbm %s2139_s0, %s1483_s30 }
  0x13   : > { %s155_s7 = scalar_lea.vmem [#allocation4], %s1405_s29  ;;  %s161_s9 = sshll.u32 %s160_s6, 4  ;;  %s162_s9 = int_to_ptr.hbm [resolvable:$true] %s161_s9 }
  0x14   : > { %s163_s8 = sshll.u32 %s155_s7, 4  ;;  %p1491_p0 = pnand %p1498_p13, %p1778_p4  ;;  %s164_s8 = int_to_ptr.vmem [resolvable:$true] %s163_s8 }
  0x15   : > { %p1408_p1 = scmp.ge.s32.totalorder %s1688_s17, 1  ;;  %s152_s10 = scalar_lea.sflag [#allocation5], %s151_s28 }
  0x16   : > { %s1690_s11 = smov 128   ;;  %s1691_s18 = smov 8  }
  0x17   : > { %1493 = dma.hbm_to_vmem [thread:$0]  (!%p1491_p0), %s162_s9, 1024, %s164_s8, %s152_s10, %s1690_s11, %s1690_s11, %s1691_s18  }
  0x18   : > { %p171_p2 = scmp.lt.s32.totalorder %s1688_s17, 3 }
  0x1a   : > { %p172_p3 = pnand %p1408_p1, %p171_p2 }
  0x1b   : > { %s1811_s19 = sand.u32 (!%p172_p3), 1, %s1672_s13  }
  0x1c   : > { %175 = sbr.rel (%p172_p3) target bundleno = 560 (0x230), region = 32  ;;  %s1409_s21 = sshll.u32 (!%p172_p3), %s1811_s19, 6 }
  0x1d   : > { %s178_s23 = scalar_lea.sflag (!%p172_p3), [#allocation5], %s1811_s19  ;;  %s1815_s29 = scalar_lea.vmem (!%p172_p3), [#allocation4], %s1409_s21 }
  0x21   : > { %1659 = dma.done.wait (%p1784_p8), %s178_s23, 1024  }
  0x22   : > { %1661 = vsyncadd (%p1784_p8), %s178_s23, 4294966272  ;;  %vm271_vm0 = vcmask 1041409   ;;  %v1692_v0 = vmov 0.0   ;;  %vm273_vm1 = vcmask 1045509   ;;  %vm276_vm2 = vcmask 1042434   ;;  %s1693_s22 = smov 1  }
  0x23   : > { %v270_v1 = vrot.slane %v1692_v0, 7  ;;  %v275_v2 = vrot.slane %v1692_v0, 6  ;;  %vm278_vm3 = vcmask 1046534   ;;  %v280_v4 = vrot.slane %v1692_v0, 5  ;;  %v1410_v9 = vld [vmem:[%s1815_s29 + $0x1] sm:$0x1] }
  0x24   : > { %vm281_vm4 = vcmask 1043459   ;;  %vm283_vm5 = vcmask 1047559   ;;  %v1411_v10 = vld [vmem:[%s1815_s29 + $0x11] sm:$0x1]  ;;  %v1412_v11 = vld [vmem:[%s1815_s29 + $0x21] sm:$0x1] }
  0x25   : > { %v272_v3 = vsel %vm271_vm0, %v270_v1, 0.0  ;;  %v1413_v13 = vld [vmem:[%s1815_s29 + $0x31] sm:$0x1]  ;;  %v353_v14 = vrot.slane %v1411_v10, 7  ;;  %v356_v15 = vrot.slane %v1412_v11, 6  ;;  %s1694_s24 = smov 37  }
  0x26   : > { %v274_v5 = vsel %vm273_vm1, %v270_v1, %v272_v3  ;;  %v299_v16 = vld [vmem:[%s1815_s29] sm:$0x1]  ;;  %v359_v17 = vrot.slane %v1413_v13, 5  ;;  %v300_v18 = vld [vmem:[%s1815_s29 + $0x10] sm:$0x1]  ;;  %s1695_s28 = smov 19  }
  0x27   : > { %v277_v6 = vsel %vm276_vm2, %v275_v2, %v274_v5  ;;  %v301_v19 = vld [vmem:[%s1815_s29 + $0x20] sm:$0x1]  ;;  %v354_v20 = vsel %vm271_vm0, %v353_v14, %v1410_v9  ;;  %v302_v21 = vld [vmem:[%s1815_s29 + $0x30] sm:$0x1]  ;;  %v314_v22 = vrot.slane %v300_v18, 7  ;;  %s1696_s30 = smov 55  }
  0x28   : > { %v279_v7 = vsel %vm278_vm3, %v275_v2, %v277_v6  ;;  %v317_v23 = vrot.slane %v301_v19, 6  ;;  %v1414_v24 = vld [vmem:[%s1815_s29 + $0x2] sm:$0x1]  ;;  %v355_v25 = vsel %vm273_vm1, %v353_v14, %v354_v20  ;;  %v320_v26 = vrot.slane %v302_v21, 5  ;;  %v1415_v27 = vld [vmem:[%s1815_s29 + $0x12] sm:$0x1] }
  0x29   : > { %v282_v8 = vsel %vm281_vm4, %v280_v4, %v279_v7  ;;  %v1416_v28 = vld [vmem:[%s1815_s29 + $0x22] sm:$0x1]  ;;  %v357_v29 = vsel %vm276_vm2, %v356_v15, %v355_v25  ;;  %v315_v30 = vsel %vm271_vm0, %v314_v22, %v299_v16  ;;  %v1417_v31 = vld [vmem:[%s1815_s29 + $0x32] sm:$0x1]  ;;  %v392_v32 = vrot.slane %v1415_v27, 7  ;;  %s1697_s4 = smov 91  }
  0x2a   : > { %v1833_v12 = vsel %vm283_vm5, %v280_v4, %v282_v8  ;;  %v395_v33 = vrot.slane %v1416_v28, 6  ;;  %v1422_v34 = vld [vmem:[%s1815_s29 + $0x4] sm:$0x1]  ;;  %v358_v35 = vsel %vm278_vm3, %v356_v15, %v357_v29  ;;  %v316_v36 = vsel %vm273_vm1, %v314_v22, %v315_v30  ;;  %v1423_v38 = vld [vmem:[%s1815_s29 + $0x14] sm:$0x1]  ;;  %s1698_s5 = smov 73  }
  0x2b   : > { %285 = vrot.lane.b32.xlu0 %v1833_v12, %s1693_s22  ;;  %v398_v37 = vrot.slane %v1417_v31, 5  ;;  %v1424_v39 = vld [vmem:[%s1815_s29 + $0x24] sm:$0x1]  ;;  %v360_v40 = vsel %vm281_vm4, %v359_v17, %v358_v35  ;;  %v318_v41 = vsel %vm276_vm2, %v317_v23, %v316_v36  ;;  %v393_v42 = vsel %vm271_vm0, %v392_v32, %v1414_v24  ;;  %v1425_v43 = vld [vmem:[%s1815_s29 + $0x34] sm:$0x1]  ;;  %s1699_s6 = smov 109  }
  0x2c   : > { %v470_v44 = vrot.slane %v1423_v38, 7  ;;  %v361_v45 = vsel %vm283_vm5, %v359_v17, %v360_v40  ;;  %v319_v46 = vsel %vm278_vm3, %v317_v23, %v318_v41  ;;  %v394_v47 = vsel %vm273_vm1, %v392_v32, %v393_v42  ;;  %v1427_v49 = vld [vmem:[%s1815_s29 + $0x15] sm:$0x1]  ;;  %v1428_v50 = vld [vmem:[%s1815_s29 + $0x25] sm:$0x1]  ;;  %s1700_s7 = smov 35  }
  0x2d   : > { %v473_v48 = vrot.slane %v1424_v39, 6  ;;  %362 = vrot.lane.b32.xlu1 %v361_v45, %s1694_s24  ;;  %v321_v51 = vsel %vm281_vm4, %v320_v26, %v319_v46  ;;  %v396_v52 = vsel %vm276_vm2, %v395_v33, %v394_v47  ;;  %v476_v54 = vrot.slane %v1425_v43, 5  ;;  %v1426_v55 = vld [vmem:[%s1815_s29 + $0x5] sm:$0x1]  ;;  %v1868_v56 = vld [vmem:[%s1815_s29 + $0x35] sm:$0x1] }
  0x2e   : > { %v471_v53 = vsel %vm271_vm0, %v470_v44, %v1422_v34  ;;  %v322_v57 = vsel %vm283_vm5, %v320_v26, %v321_v51  ;;  %v397_v58 = vsel %vm278_vm3, %v395_v33, %v396_v52  ;;  %v509_v60 = vrot.slane %v1427_v49, 7  ;;  %v1439_v61 = vld [vmem:[%s1815_s29 + $0x18] sm:$0x1]  ;;  %v1440_v62 = vld [vmem:[%s1815_s29 + $0x28] sm:$0x1]  ;;  %s1701_s8 = smov 127  }
  0x2f   : > { %v472_v59 = vsel %vm273_vm1, %v470_v44, %v471_v53  ;;  %v399_v63 = vsel %vm281_vm4, %v398_v37, %v397_v58  ;;  %v512_v2 = vrot.slane %v1428_v50, 6  ;;  %v1438_v3 = vld [vmem:[%s1815_s29 + $0x8] sm:$0x1]  ;;  %v1441_v4 = vld [vmem:[%s1815_s29 + $0x38] sm:$0x1]  ;;  %v515_v7 = vrot.slane %v1868_v56, 5 }
  0x30   : > { %v474_v1 = vsel %vm276_vm2, %v473_v48, %v472_v59  ;;  %v510_v6 = vsel %vm271_vm0, %v509_v60, %v1426_v55  ;;  %v631_v8 = vrot.slane %v1439_v61, 7  ;;  %v1419_v9 = vld [vmem:[%s1815_s29 + $0x13] sm:$0x1]  ;;  %v1420_v10 = vld [vmem:[%s1815_s29 + $0x23] sm:$0x1]  ;;  %v400_v11 = vsel %vm283_vm5, %v398_v37, %v399_v63  ;;  %s1702_s9 = smov 53  }
  0x31   : > { %v475_v5 = vsel %vm278_vm3, %v473_v48, %v474_v1  ;;  %v511_v14 = vsel %vm273_vm1, %v509_v60, %v510_v6  ;;  %v634_v15 = vrot.slane %v1440_v62, 6  ;;  %v1418_v16 = vld [vmem:[%s1815_s29 + $0x3] sm:$0x1]  ;;  %v1421_v17 = vld [vmem:[%s1815_s29 + $0x33] sm:$0x1]  ;;  %v637_v20 = vrot.slane %v1441_v4, 5 }
  0x32   : > { %v477_v13 = vsel %vm281_vm4, %v476_v54, %v475_v5  ;;  %v513_v18 = vsel %vm276_vm2, %v512_v2, %v511_v14  ;;  %v632_v19 = vsel %vm271_vm0, %v631_v8, %v1438_v3  ;;  %v431_v21 = vrot.slane %v1419_v9, 7  ;;  %v1443_v22 = vld [vmem:[%s1815_s29 + $0x19] sm:$0x1]  ;;  %v1444_v23 = vld [vmem:[%s1815_s29 + $0x29] sm:$0x1]  ;;  %s1703_s10 = smov 125  }
  0x33   : > { %323 = vrot.lane.b32.xlu0 %v322_v57, %s1695_s28  ;;  %v478_v24 = vsel %vm283_vm5, %v476_v54, %v477_v13  ;;  %v514_v25 = vsel %vm278_vm3, %v512_v2, %v513_v18  ;;  %v633_v26 = vsel %vm273_vm1, %v631_v8, %v632_v19  ;;  %v434_v27 = vrot.slane %v1420_v10, 6  ;;  %v1442_v28 = vld [vmem:[%s1815_s29 + $0x9] sm:$0x1]  ;;  %v1459_v33 = vld [vmem:[%s1815_s29 + $0x1d] sm:$0x1]  ;;  %s1704_s11 = smov 17  }
  0x34   : > { %v635_v29 = vsel %vm276_vm2, %v634_v15, %v633_v26  ;;  %v432_v30 = vsel %vm271_vm0, %v431_v21, %v1418_v16  ;;  %v437_v31 = vrot.slane %v1421_v17, 5  ;;  %v670_v32 = vrot.slane %v1443_v22, 7  ;;  %v1460_v38 = vld [vmem:[%s1815_s29 + $0x2d] sm:$0x1]  ;;  %v1906_v40 = vld [vmem:[%s1815_s29 + $0x39] sm:$0x1] }
  0x35   : > { %401 = vrot.lane.b32.xlu1 %v400_v11, %s1696_s30  ;;  %v516_v34 = vsel %vm281_vm4, %v515_v7, %v514_v25  ;;  %v636_v35 = vsel %vm278_vm3, %v634_v15, %v635_v29  ;;  %v433_v36 = vsel %vm273_vm1, %v431_v21, %v432_v30  ;;  %v673_v37 = vrot.slane %v1444_v23, 6  ;;  %v1458_v42 = vld [vmem:[%s1815_s29 + $0xd] sm:$0x1]  ;;  %v1431_v43 = vld [vmem:[%s1815_s29 + $0x16] sm:$0x1]  ;;  %s1705_s18 = smov 89  }
  0x36   : > { %v435_v39 = vsel %vm276_vm2, %v434_v27, %v433_v36  ;;  %v671_v41 = vsel %vm271_vm0, %v670_v32, %v1442_v28  ;;  %v638_v44 = vsel %vm281_vm4, %v637_v20, %v636_v35  ;;  %v826_v47 = vrot.slane %v1459_v33, 7  ;;  %v1430_v48 = vld [vmem:[%s1815_s29 + $0x6] sm:$0x1]  ;;  %v1433_v53 = vld [vmem:[%s1815_s29 + $0x36] sm:$0x1]  ;;  %s1706_s21 = smov 15  }
  0x37   : > { %v436_v45 = vsel %vm278_vm3, %v434_v27, %v435_v39  ;;  %v672_v46 = vsel %vm273_vm1, %v670_v32, %v671_v41  ;;  %v1432_v49 = vld [vmem:[%s1815_s29 + $0x26] sm:$0x1]  ;;  %v517_v50 = vsel %vm283_vm5, %v515_v7, %v516_v34  ;;  %v829_v52 = vrot.slane %v1460_v38, 6  ;;  %v1451_v54 = vld [vmem:[%s1815_s29 + $0x1b] sm:$0x1]  ;;  %s1707_s23 = smov 71  }
  0x38   : > { %v438_v51 = vsel %vm281_vm4, %v437_v31, %v436_v45  ;;  %v674_v56 = vsel %vm276_vm2, %v673_v37, %v672_v46  ;;  %v1461_v57 = vld [vmem:[%s1815_s29 + $0x3d] sm:$0x1]  ;;  %v827_v58 = vsel %vm271_vm0, %v826_v47, %v1458_v42  ;;  %v548_v59 = vrot.slane %v1431_v43, 7  ;;  %v1450_v60 = vld [vmem:[%s1815_s29 + $0xb] sm:$0x1]  ;;  %s1708_s22 = smov 33  }
  0x39   : > { %v439_v55 = vsel %vm283_vm5, %v437_v31, %v438_v51  ;;  %v639_v61 = vsel %vm283_vm5, %v637_v20, %v638_v44  ;;  %v676_v62 = vrot.slane %v1906_v40, 5  ;;  %v828_v63 = vsel %vm273_vm1, %v826_v47, %v827_v58  ;;  %v1452_v2 = vld [vmem:[%s1815_s29 + $0x2b] sm:$0x1]  ;;  %v1463_v3 = vld [vmem:[%s1815_s29 + $0x1e] sm:$0x1]  ;;  %s1710_s24 = smov 51  }
  0x3a   : > { %440 = vrot.lane.b32.xlu2 %v439_v55, %s1698_s5  ;;  %v551_v1 = vrot.slane %v1432_v49, 6  ;;  %v830_v4 = vsel %vm276_vm2, %v829_v52, %v828_v63  ;;  %v549_v5 = vsel %vm271_vm0, %v548_v59, %v1430_v48  ;;  %v554_v6 = vrot.slane %v1433_v53, 5  ;;  %v1464_v8 = vld [vmem:[%s1815_s29 + $0x2e] sm:$0x1]  ;;  %v1467_v19 = vld [vmem:[%s1815_s29 + $0x1f] sm:$0x1] }
  0x3b   : > { %479 = vrot.lane.b32.xlu0 %v478_v24, %s1697_s4  ;;  %v748_v7 = vrot.slane %v1451_v54, 7  ;;  %v675_v9 = vsel %vm278_vm3, %v673_v37, %v674_v56  ;;  %v831_v10 = vsel %vm278_vm3, %v829_v52, %v830_v4  ;;  %v832_v11 = vrot.slane %v1461_v57, 5  ;;  %v1462_v14 = vld [vmem:[%s1815_s29 + $0xe] sm:$0x1]  ;;  %v1453_v25 = vld [vmem:[%s1815_s29 + $0x3b] sm:$0x1] }
  0x3c   : > { %v550_v13 = vsel %vm273_vm1, %v548_v59, %v549_v5  ;;  %v751_v17 = vrot.slane %v1452_v2, 6  ;;  %v870_v18 = vrot.slane %v1463_v3, 7  ;;  %v873_v22 = vrot.slane %v1464_v8, 6  ;;  %v1948_v26 = vld [vmem:[%s1815_s29 + $0x3e] sm:$0x1]  ;;  %s1711_s28 = smov 126  }
  0x3d   : > { %518 = vrot.lane.b32.xlu1 %v517_v50, %s1699_s6  ;;  %v552_v15 = vsel %vm276_vm2, %v551_v1, %v550_v13  ;;  %v749_v16 = vsel %vm271_vm0, %v748_v7, %v1450_v60  ;;  %v677_v23 = vsel %vm281_vm4, %v676_v62, %v675_v9  ;;  %v1435_v28 = vld [vmem:[%s1815_s29 + $0x17] sm:$0x1]  ;;  %v833_v29 = vsel %vm281_vm4, %v832_v11, %v831_v10  ;;  %v1466_v32 = vld [vmem:[%s1815_s29 + $0xf] sm:$0x1]  ;;  %v1436_v34 = vld [vmem:[%s1815_s29 + $0x27] sm:$0x1] }
  0x3e   : > { %v553_v20 = vsel %vm278_vm3, %v551_v1, %v552_v15  ;;  %v750_v21 = vsel %vm273_vm1, %v748_v7, %v749_v16  ;;  %v871_v27 = vsel %vm271_vm0, %v870_v18, %v1462_v14  ;;  %v909_v33 = vrot.slane %v1467_v19, 7  ;;  %v1434_v36 = vld [vmem:[%s1815_s29 + $0x7] sm:$0x1]  ;;  %v1437_v37 = vld [vmem:[%s1815_s29 + $0x37] sm:$0x1]  ;;  %s1712_s30 = smov 110  }
  0x3f   : > { %v555_v24 = vsel %vm281_vm4, %v554_v6, %v553_v20  ;;  %v872_v31 = vsel %vm273_vm1, %v870_v18, %v871_v27  ;;  %v752_v35 = vsel %vm276_vm2, %v751_v17, %v750_v21  ;;  %v1447_v38 = vld [vmem:[%s1815_s29 + $0x1a] sm:$0x1]  ;;  %v678_v39 = vsel %vm283_vm5, %v676_v62, %v677_v23  ;;  %v1468_v42 = vld [vmem:[%s1815_s29 + $0x2f] sm:$0x1]  ;;  %v1448_v44 = vld [vmem:[%s1815_s29 + $0x2a] sm:$0x1] }
  0x40   : > { %v556_v30 = vsel %vm283_vm5, %v554_v6, %v555_v24  ;;  %v754_v40 = vrot.slane %v1453_v25, 5  ;;  %v874_v41 = vsel %vm276_vm2, %v873_v22, %v872_v31  ;;  %v592_v43 = vrot.slane %v1435_v28, 7  ;;  %v1446_v49 = vld [vmem:[%s1815_s29 + $0xa] sm:$0x1]  ;;  %v1455_v50 = vld [vmem:[%s1815_s29 + $0x1c] sm:$0x1] }
  0x41   : > { %v834_v45 = vsel %vm283_vm5, %v832_v11, %v833_v29  ;;  %v876_v46 = vrot.slane %v1948_v26, 5  ;;  %v910_v47 = vsel %vm271_vm0, %v909_v33, %v1466_v32  ;;  %v595_v48 = vrot.slane %v1436_v34, 6  ;;  %v1449_v58 = vld [vmem:[%s1815_s29 + $0x3a] sm:$0x1]  ;;  %v1454_v60 = vld [vmem:[%s1815_s29 + $0xc] sm:$0x1] }
  0x42   : > { %557 = vrot.lane.b32.xlu2 %v556_v30, %s1701_s8  ;;  %v753_v51 = vsel %vm278_vm3, %v751_v17, %v752_v35  ;;  %v593_v52 = vsel %vm271_vm0, %v592_v43, %v1434_v36  ;;  %v598_v53 = vrot.slane %v1437_v37, 5  ;;  %v709_v54 = vrot.slane %v1447_v38, 7  ;;  %v1456_v5 = vld [vmem:[%s1815_s29 + $0x2c] sm:$0x1]  ;;  %v1469_v6 = vld [vmem:[%s1815_s29 + $0x3f] sm:$0x1] }
  0x43   : > { %640 = vrot.lane.b32.xlu0 %v639_v61, %s1700_s7  ;;  %v875_v55 = vsel %vm278_vm3, %v873_v22, %v874_v41  ;;  %v912_v56 = vrot.slane %v1468_v42, 6  ;;  %v594_v57 = vsel %vm273_vm1, %v592_v43, %v593_v52  ;;  %v712_v59 = vrot.slane %v1448_v44, 6  ;;  %v1457_v23 = vld [vmem:[%s1815_s29 + $0x3c] sm:$0x1]  ;;  %s1709_s29 = smov 107   ;;  %s1713_s5 = smov 108  }
  0x44   : > { %v911_v61 = vsel %vm273_vm1, %v909_v33, %v910_v47  ;;  %v596_v62 = vsel %vm276_vm2, %v595_v48, %v594_v57  ;;  %v710_v63 = vsel %vm271_vm0, %v709_v54, %v1446_v49  ;;  %v787_v1 = vrot.slane %v1455_v50, 7  ;;  %s1714_s7 = smov 92  }
  0x45   : > { %679 = vrot.lane.b32.xlu1 %v678_v39, %s1702_s9  ;;  %v755_v2 = vsel %vm281_vm4, %v754_v40, %v753_v51  ;;  %v597_v3 = vsel %vm278_vm3, %v595_v48, %v596_v62  ;;  %v711_v4 = vsel %vm273_vm1, %v709_v54, %v710_v63  ;;  %v715_v9 = vrot.slane %v1449_v58, 5 }
  0x46   : > { %v599_v7 = vsel %vm281_vm4, %v598_v53, %v597_v3  ;;  %v713_v8 = vsel %vm276_vm2, %v712_v59, %v711_v4  ;;  %v788_v10 = vsel %vm271_vm0, %v787_v1, %v1454_v60  ;;  %v877_v11 = vsel %vm281_vm4, %v876_v46, %v875_v55 }
  0x47   : > { %v913_v13 = vsel %vm276_vm2, %v912_v56, %v911_v61  ;;  %v600_v14 = vsel %vm283_vm5, %v598_v53, %v599_v7  ;;  %v714_v15 = vsel %vm278_vm3, %v712_v59, %v713_v8  ;;  %v756_v16 = vsel %vm283_vm5, %v754_v40, %v755_v2 }
  0x48   : > { %v790_v17 = vrot.slane %v1456_v5, 6  ;;  %v915_v18 = vrot.slane %v1469_v6, 5  ;;  %v789_v19 = vsel %vm273_vm1, %v787_v1, %v788_v10  ;;  %v878_v20 = vsel %vm283_vm5, %v876_v46, %v877_v11 }
  0x49   : > { %v914_v21 = vsel %vm278_vm3, %v912_v56, %v913_v13  ;;  %v716_v22 = vsel %vm281_vm4, %v715_v9, %v714_v15  ;;  %v793_v27 = vrot.slane %v1457_v23, 5  ;;  %vm209_vm6 = vcmask 150664  }
  0x4a   : > { %601 = vrot.lane.b32.xlu2 %v600_v14, %s1704_s11  ;;  %v791_v24 = vsel %vm276_vm2, %v790_v17, %v789_v19  ;;  %v916_v25 = vsel %vm281_vm4, %v915_v18, %v914_v21  ;;  %v717_v26 = vsel %vm283_vm5, %v715_v9, %v716_v22  ;;  %vm211_vm7 = vcmask 298264   ;;  %s1484_s11 = smul.u32 24, %s1811_s19 }
  0x4b   : > { %835 = vrot.lane.b32.xlu0 %v834_v45, %s1703_s10  ;;  %v792_v28 = vsel %vm278_vm3, %v790_v17, %v791_v24  ;;  %v917_v29 = vsel %vm283_vm5, %v915_v18, %v916_v25  ;;  %vm207_vm8 = vcmask 3072   ;;  %vm213_vm9 = vcmask 445864  }
  0x4c   : > { %v794_v30 = vsel %vm281_vm4, %v793_v27, %v792_v28  ;;  %208 = vst.msk [vmem:[#allocation2] sm:$0xf] %vm207_vm8, %v1692_v0  ;;  %vm215_vm10 = vcmask 593464   ;;  %vm217_vm11 = vcmask 741064   ;;  %vm219_vm12 = vcmask 888664  }
  0x4d   : > { %757 = vrot.lane.b32.xlu1 %v756_v16, %s1705_s18  ;;  %v795_v31 = vsel %vm283_vm5, %v793_v27, %v794_v30  ;;  %210 = vst.msk [vmem:[#allocation2] sm:$0xf] %vm209_vm6, %v1692_v0  ;;  %vm221_vm13 = vcmask 1036264   ;;  %vm223_vm14 = vcmask 134264   ;;  %vm225_vm15 = vcmask 281864   ;;  %s1485_s18 = smul.u32 24, %s1680_s15 }
  0x4e   : > { %212 = vst.msk [vmem:[#allocation2] sm:$0xf] %vm211_vm7, %v1692_v0  ;;  %vm227_vm0 = vcmask 429464   ;;  %vm229_vm1 = vcmask 577064   ;;  %vm231_vm2 = vcmask 724664   ;;  %vm233_vm3 = vcmask 872264  }
  0x4f   : > { %214 = vst.msk [vmem:[#allocation2] sm:$0xf] %vm213_vm9, %v1692_v0  ;;  %vm235_vm4 = vcmask 1019864   ;;  %vm288_vm5 = vcmask 134152   ;;  %vm237_vm6 = vcmask 117864   ;;  %vm326_vm7 = vcmask 281752  }
  0x50   : > { %216 = vst.msk [vmem:[#allocation2] sm:$0xf] %vm215_vm10, %v1692_v0  ;;  %vm239_vm8 = vcmask 265464   ;;  %vm365_vm9 = vcmask 429352   ;;  %vm241_vm10 = vcmask 413064   ;;  %s1284_s15 = scalar_lea.sflag [#allocation6], %s1811_s19 }
  0x51   : > { %218 = vst.msk [vmem:[#allocation2] sm:$0xf] %vm217_vm11, %v1692_v0  ;;  %vm243_vm11 = vcmask 568856  }
  0x52   : > { %718 = vrot.lane.b32.xlu2 %v717_v26, %s1707_s23  ;;  %220 = vst.msk [vmem:[#allocation2] sm:$0xf] %vm219_vm12, %v1692_v0  ;;  %vm404_vm12 = vcmask 576952  }
  0x53   : > { %879 = vrot.lane.b32.xlu0 %v878_v20, %s1706_s21  ;;  %222 = vst.msk [vmem:[#allocation2] sm:$0xf] %vm221_vm13, %v1692_v0  ;;  %vm443_vm13 = vcmask 724552  }
  0x54   : > { %224 = vst.msk [vmem:[#allocation2 + $0x4] sm:$0xf] %vm223_vm14, %v1692_v0  ;;  %vm482_vm14 = vcmask 872152  }
  0x55   : > { %918 = vrot.lane.b32.xlu1 %v917_v29, %s1708_s22  ;;  %226 = vst.msk [vmem:[#allocation2 + $0x4] sm:$0xf] %vm225_vm15, %v1692_v0  ;;  %vm563_vm15 = vcmask 1044472   ;;  %s1297_s22 = scalar_lea.hbm %s2142_s3, %s1485_s18 }
  0x56   : > { %228 = vst.msk [vmem:[#allocation2 + $0x4] sm:$0xf] %vm227_vm0, %v1692_v0  ;;  %vm564_vm0 = vcmask 121860  }
  0x57   : > { %230 = vst.msk [vmem:[#allocation2 + $0x4] sm:$0xf] %vm229_vm1, %v1692_v0  ;;  %vm560_vm1 = vcmask 1039360  }
  0x58   : > { %232 = vst.msk [vmem:[#allocation2 + $0x4] sm:$0xf] %vm231_vm2, %v1692_v0  ;;  %vm521_vm2 = vcmask 1019752  }
  0x59   : > { %234 = vst.msk [vmem:[#allocation2 + $0x4] sm:$0xf] %vm233_vm3, %v1692_v0  ;;  %vm565_vm3 = vmor %vm564_vm0, %vm563_vm15  ;;  %vm921_vm15 = vcmask 396552   ;;  %vm960_vm0 = vcmask 544152  }
  0x5a   : > { %796 = vrot.lane.b32.xlu2 %v795_v31, %s1709_s29  ;;  %236 = vst.msk [vmem:[#allocation2 + $0x4] sm:$0xf] %vm235_vm4, %v1692_v0  ;;  %vm604_vm4 = vcmask 265352   ;;  %s204_s29 = scalar_lea.vmem [#allocation7], %s1484_s11 }
  0x5b   : > { %238 = vst.msk [vmem:[#allocation2 + $0x8] sm:$0xf] %vm237_vm6, %v1692_v0  ;;  %vm682_vm6 = vcmask 560552  }
  0x5c   : > { %240 = vst.msk [vmem:[#allocation2 + $0x8] sm:$0xf] %vm239_vm8, %v1692_v0  ;;  %vm841_vm8 = vcmask 1044456  }
  0x5d   : > { %242 = vst.msk [vmem:[#allocation2 + $0x8] sm:$0xf] %vm241_vm10, %v1692_v0  ;;  %vm760_vm10 = vcmask 855752  }
  0x5e   : > { %244 = vst.msk [vmem:[#allocation2 + $0x8] sm:$0xf] %vm243_vm11, %v1692_v0  ;;  %vm838_vm11 = vcmask 1022976  }
  0x62   : > { %957 = vrot.lane.b32.xlu2 %v1833_v12, %s1710_s24  ;;  %s1299_s24 = sshll.u32 %s204_s29, 4  ;;  %s1300_s24 = int_to_ptr.vmem [resolvable:$true] %s1299_s24 }
  0x94   : > { %v441_v12 = vpop.permute.xlu2 %440 }
  0x9c   : > { %v558_v34 = vpop.permute.xlu2 %557 }
  0x9d   : > { %v286_v32 = vpop.permute.xlu0 %285  ;;  %v559_v39 = vrot.slane %v558_v34, 4 }
  0x9e   : > { %289 = vst.msk [vmem:[#allocation2] sm:$0xf] %vm288_vm5, %v286_v32  ;;  %vm643_vm5 = vcmask 412952  }
  0x9f   : > { %v363_v33 = vpop.permute.xlu1 %362  ;;  %v561_v41 = vsel %vm560_vm1, %v559_v39, %v558_v34 }
  0xa4   : > { %v602_v37 = vpop.permute.xlu2 %601 }
  0xa5   : > { %v324_v35 = vpop.permute.xlu0 %323 }
  0xa6   : > { %327 = vst.msk [vmem:[#allocation2] sm:$0xf] %vm326_vm7, %v324_v35  ;;  %vm721_vm7 = vcmask 708152  }
  0xa7   : > { %366 = vst.msk [vmem:[#allocation2] sm:$0xf] %vm365_vm9, %v363_v33  ;;  %v402_v36 = vpop.permute.xlu1 %401  ;;  %vm842_vm9 = vcmask 105476  }
  0xa8   : > { %405 = vst.msk [vmem:[#allocation2] sm:$0xf] %vm404_vm12, %v402_v36  ;;  %vm799_vm12 = vcmask 1003352  }
  0xa9   : > { %444 = vst.msk [vmem:[#allocation2] sm:$0xf] %vm443_vm13, %v441_v12  ;;  %vm843_vm13 = vmor %vm842_vm9, %vm841_vm8  ;;  %vm1174_vm8 = vcmask 736256   ;;  %vm1021_vm9 = vcmask 1031168  }
  0xac   : > { %v719_v42 = vpop.permute.xlu2 %718 }
  0xad   : > { %v480_v38 = vpop.permute.xlu0 %479 }
  0xae   : > { %483 = vst.msk [vmem:[#allocation2] sm:$0xf] %vm482_vm14, %v480_v38  ;;  %vm882_vm14 = vcmask 248952  }
  0xaf   : > { %v519_v40 = vpop.permute.xlu1 %518 }
  0xb0   : > { %522 = vst.msk [vmem:[#allocation2] sm:$0xf] %vm521_vm2, %v519_v40  ;;  %vm977_vm2 = vcmask 257024  }
  0xb1   : > { %566 = vst.msk [vmem:[#allocation2] sm:$0xff] %vm565_vm3, %v561_v41  ;;  %vm1003_vm3 = vcmask 261124  }
  0xb2   : > { %605 = vst.msk [vmem:[#allocation2 + $0x4] sm:$0xf] %vm604_vm4, %v602_v37  ;;  %vm1072_vm4 = vcmask 891904  }
  0xb4   : > { %v797_v45 = vpop.permute.xlu2 %796 }
  0xb5   : > { %v641_v0 = vpop.permute.xlu0 %640 }
  0xb6   : > { %644 = vst.msk [vmem:[#allocation2 + $0x4] sm:$0xf] %vm643_vm5, %v641_v0  ;;  %vm1098_vm5 = vcmask 883712  }
  0xb7   : > { %v680_v43 = vpop.permute.xlu1 %679 }
  0xb8   : > { %683 = vst.msk [vmem:[#allocation2 + $0x4] sm:$0xf] %vm682_vm6, %v680_v43  ;;  %vm1149_vm6 = vcmask 744448  }
  0xb9   : > { %722 = vst.msk [vmem:[#allocation2 + $0x4] sm:$0xf] %vm721_vm7, %v719_v42  ;;  %vm1123_vm7 = vcmask 752640  }
  0xbc   : > { %v958_v50 = vpop.permute.xlu2 %957 }
  0xbd   : > { %v836_v44 = vpop.permute.xlu0 %835 }
  0xbe   : > { %v837_v46 = vrot.slane %v836_v44, 4 }
  0xbf   : > { %v758_v47 = vpop.permute.xlu1 %757 }
  0xc0   : > { %761 = vst.msk [vmem:[#allocation2 + $0x4] sm:$0xf] %vm760_vm10, %v758_v47  ;;  %v839_v48 = vsel %vm838_vm11, %v837_v46, %v836_v44  ;;  %vm1209_vm10 = vcmask 1043456   ;;  %vm1047_vm11 = vcmask 900096  }
  0xc1   : > { %800 = vst.msk [vmem:[#allocation2 + $0x4] sm:$0xf] %vm799_vm12, %v797_v45  ;;  %vm1281_vm12 = vcmask 261120  }
  0xc2   : > { %844 = vst.msk [vmem:[#allocation2 + $0x4] sm:$0xff] %vm843_vm13, %v839_v48 }
  0xc5   : > { %v880_v49 = vpop.permute.xlu0 %879 }
  0xc6   : > { %883 = vst.msk [vmem:[#allocation2 + $0x8] sm:$0xf] %vm882_vm14, %v880_v49 }
  0xc7   : > { %v919_v51 = vpop.permute.xlu1 %918 }
  0xc8   : > { %922 = vst.msk [vmem:[#allocation2 + $0x8] sm:$0xf] %vm921_vm15, %v919_v51 }
  0xc9   : > { %v2026_v52 = vld [vmem:[#allocation2] sm:$0xff]  ;;  %961 = vst.msk [vmem:[#allocation2 + $0x8] sm:$0xf] %vm960_vm0, %v958_v50 }
  0xca   : > { %966 = vst [vmem:[#allocation1] ss:$2 sm:$0xff] %v2026_v52 }
  0xd0   : > { %v963_v55 = vld [vmem:[#allocation2 + $0x8] sm:$0xf] }
  0xd1   : > { %v969_v53 = vld.sshfl [vmem:[#allocation1] sm:$0xff pattern:$0x75316420]  ;;  %v970_v54 = vld.sshfl [vmem:[#allocation1 + $0x8] sm:$0xff pattern:$0x75316420] }
  0xd2   : > { %984 = vst [vmem:[#allocation1 + $0x1] ss:$2 sm:$0xff] %v2026_v52  ;;  %v980_v59 = vld [vmem:[#allocation2 + $0x8] sm:$0xf] }
  0xd3   : > { %975 = vst [vmem:[#allocation3] sm:$0xf] %v969_v53  ;;  %v1006_v62 = vld [vmem:[#allocation2 + $0x8] sm:$0xf] }
  0xd4   : > { %976 = vst [vmem:[#allocation3 + $0x8] sm:$0xf] %v970_v54  ;;  %v1031_v4 = vld [vmem:[#allocation2 + $0x8] sm:$0xf]  ;;  %v1199_v54 = vld [vmem:[%s2141_s2] sm:$0xff] }
  0xd5   : > { %968 = vst [vmem:[#allocation1 + $0x10] ss:$2 sm:$0xff] %v963_v55  ;;  %v1057_v8 = vld [vmem:[#allocation2 + $0x8] sm:$0xf]  ;;  %v1716_v55 = vmov 0  }
  0xd6   : > { %v1082_v11 = vld [vmem:[#allocation2 + $0x8] sm:$0xf]  ;;  %1575 = vset.pattern.permute.xlu0 %v1716_v55 }
  0xd7   : > { %v1108_v16 = vld [vmem:[#allocation2 + $0x8] sm:$0xf] }
  0xd8   : > { %v1133_v20 = vld [vmem:[#allocation2 + $0x8] sm:$0xf] }
  0xd9   : > { %v2030_v56 = vld.sshfl [vmem:[#allocation1] sm:$0xff pattern:$0x75316420]  ;;  %v2032_v57 = vld.sshfl [vmem:[#allocation1 + $0x8] sm:$0xff pattern:$0x75316420] }
  0xda   : > { %1009 = vst [vmem:[#allocation1] ss:$2 sm:$0xff] %v2026_v52  ;;  %v1159_v23 = vld [vmem:[#allocation2 + $0x8] sm:$0xf] }
  0xdc   : > { %v971_v58 = vld.sshfl [vmem:[#allocation1 + $0x10] sm:$0xff pattern:$0x75316420] }
  0xdd   : > { %986 = vst [vmem:[#allocation1 + $0x11] ss:$2 sm:$0xff] %v980_v59 }
  0xde   : > { %978 = vst.msk [vmem:[#allocation3 + $0x10] sm:$0xf] %vm977_vm2, %v971_v58 }
  0xe1   : > { %v2036_v60 = vld.sshfl [vmem:[#allocation1] sm:$0xff pattern:$0x75316420]  ;;  %v2038_v61 = vld.sshfl [vmem:[#allocation1 + $0x8] sm:$0xff pattern:$0x75316420] }
  0xe2   : > { %1035 = vst [vmem:[#allocation1 + $0x1] ss:$2 sm:$0xff] %v2026_v52 }
  0xe4   : > { %v989_v63 = vld.sshfl [vmem:[#allocation1 + $0x10] sm:$0xff pattern:$0x75316420] }
  0xe5   : > { %994 = vrot.lane.b32.xlu1 %v989_v63, %s1701_s8  ;;  %1011 = vst [vmem:[#allocation1 + $0x10] ss:$2 sm:$0xff] %v1006_v62 }
  0xe9   : > { %v1038_v1 = vld.sshfl [vmem:[#allocation1] sm:$0xff pattern:$0x75316420]  ;;  %v1039_v2 = vld.sshfl [vmem:[#allocation1 + $0x8] sm:$0xff pattern:$0x75316420] }
  0xea   : > { %1060 = vst [vmem:[#allocation1] ss:$2 sm:$0xff] %v2026_v52 }
  0xec   : > { %v1014_v3 = vld.sshfl [vmem:[#allocation1 + $0x10] sm:$0xff pattern:$0x75316420] }
  0xed   : > { %1019 = vrot.lane.b32.xlu1 %v1014_v3, %s1711_s28  ;;  %1037 = vst [vmem:[#allocation1 + $0x11] ss:$2 sm:$0xff] %v1031_v4 }
  0xf1   : > { %v1064_v5 = vld.sshfl [vmem:[#allocation1 + $0x8] sm:$0xff pattern:$0x75316420]  ;;  %v1063_v6 = vld.sshfl [vmem:[#allocation1] sm:$0xff pattern:$0x75316420] }
  0xf2   : > { %1068 = vrot.lane.b32.xlu0 %v1064_v5, %s1699_s6  ;;  %1086 = vst [vmem:[#allocation1 + $0x1] ss:$2 sm:$0xff] %v2026_v52 }
  0xf4   : > { %v1040_v7 = vld.sshfl [vmem:[#allocation1 + $0x10] sm:$0xff pattern:$0x75316420] }
  0xf5   : > { %1045 = vrot.lane.b32.xlu2 %v1040_v7, %s1712_s30  ;;  %1062 = vst [vmem:[#allocation1 + $0x10] ss:$2 sm:$0xff] %v1057_v8 }
  0xf9   : > { %v1089_v9 = vld.sshfl [vmem:[#allocation1] sm:$0xff pattern:$0x75316420]  ;;  %v1090_v10 = vld.sshfl [vmem:[#allocation1 + $0x8] sm:$0xff pattern:$0x75316420] }
  0xfa   : > { %1092 = vrot.lane.b32.xlu1 %v1089_v9, %s1713_s5  ;;  %1111 = vst [vmem:[#allocation1] ss:$2 sm:$0xff] %v2026_v52 }
  0xfc   : > { %v1065_v13 = vld.sshfl [vmem:[#allocation1 + $0x10] sm:$0xff pattern:$0x75316420] }
  0xfd   : > { %1066 = vrot.lane.b32.xlu2 %v1063_v6, %s1699_s6  ;;  %1070 = vrot.lane.b32.xlu0 %v1065_v13, %s1699_s6  ;;  %1088 = vst [vmem:[#allocation1 + $0x11] ss:$2 sm:$0xff] %v1082_v11  ;;  %s1715_s6 = smov 90   ;;  %v1183_v11 = vld [vmem:[%s2140_s1] sm:$0xff] }
 0x101   : > { %v1114_v14 = vld.sshfl [vmem:[#allocation1] sm:$0xff pattern:$0x75316420]  ;;  %v1115_v15 = vld.sshfl [vmem:[#allocation1 + $0x8] sm:$0xff pattern:$0x75316420] }
 0x102   : > { %1137 = vst [vmem:[#allocation1 + $0x1] ss:$2 sm:$0xff] %v2026_v52 }
 0x104   : > { %v1091_v17 = vld.sshfl [vmem:[#allocation1 + $0x10] sm:$0xff pattern:$0x75316420] }
 0x105   : > { %1094 = vrot.lane.b32.xlu2 %v1090_v10, %s1713_s5  ;;  %1117 = vrot.lane.b32.xlu0 %v1114_v14, %s1714_s7  ;;  %1113 = vst [vmem:[#allocation1 + $0x10] ss:$2 sm:$0xff] %v1108_v16 }
 0x106   : > { %1096 = vrot.lane.b32.xlu1 %v1091_v17, %s1713_s5 }
 0x109   : > { %v1140_v18 = vld.sshfl [vmem:[#allocation1] sm:$0xff pattern:$0x75316420]  ;;  %v1141_v19 = vld.sshfl [vmem:[#allocation1 + $0x8] sm:$0xff pattern:$0x75316420] }
 0x10a   : > { %1162 = vst [vmem:[#allocation1] ss:$2 sm:$0xff] %v2026_v52 }
 0x10c   : > { %v1116_v21 = vld.sshfl [vmem:[#allocation1 + $0x10] sm:$0xff pattern:$0x75316420] }
 0x10d   : > { %1143 = vrot.lane.b32.xlu2 %v1140_v18, %s1697_s4  ;;  %1145 = vrot.lane.b32.xlu0 %v1141_v19, %s1697_s4  ;;  %1139 = vst [vmem:[#allocation1 + $0x11] ss:$2 sm:$0xff] %v1133_v20 }
 0x10e   : > { %1119 = vrot.lane.b32.xlu1 %v1115_v15, %s1714_s7 }
 0x111   : > { %v1166_v22 = vld.sshfl [vmem:[#allocation1 + $0x8] sm:$0xff pattern:$0x75316420]  ;;  %v1165_v25 = vld.sshfl [vmem:[#allocation1] sm:$0xff pattern:$0x75316420] }
 0x114   : > { %v1142_v24 = vld.sshfl [vmem:[#allocation1 + $0x10] sm:$0xff pattern:$0x75316420] }
 0x115   : > { %1170 = vrot.lane.b32.xlu0 %v1166_v22, %s1715_s6  ;;  %1147 = vrot.lane.b32.xlu2 %v1142_v24, %s1697_s4  ;;  %1164 = vst [vmem:[#allocation1 + $0x10] ss:$2 sm:$0xff] %v1159_v23  ;;  %s1626_s4 = scalar_lea.hbm %s2142_s3, 48 }
 0x116   : > { %1121 = vrot.lane.b32.xlu1 %v1116_v21, %s1714_s7 }
 0x11c   : > { %v1167_v26 = vld.sshfl [vmem:[#allocation1 + $0x10] sm:$0xff pattern:$0x75316420] }
 0x11d   : > { %1168 = vrot.lane.b32.xlu2 %v1165_v25, %s1715_s6  ;;  %1172 = vrot.lane.b32.xlu0 %v1167_v26, %s1715_s6 }
 0x11e   : > { %1017 = vrot.lane.b32.xlu1 %v2038_v61, %s1711_s28 }
 0x125   : > { %1041 = vrot.lane.b32.xlu2 %v1038_v1, %s1712_s30  ;;  %1015 = vrot.lane.b32.xlu0 %v2036_v60, %s1711_s28  ;;  %s1301_s28 = sshll.u32 %s1297_s22, 4  ;;  %s1302_s28 = int_to_ptr.hbm [resolvable:$true] %s1301_s28 }
 0x126   : > { %990 = vrot.lane.b32.xlu1 %v2030_v56, %s1701_s8 }
 0x12d   : > { %992 = vrot.lane.b32.xlu2 %v2032_v57, %s1701_s8  ;;  %1043 = vrot.lane.b32.xlu0 %v1039_v2, %s1712_s30  ;;  %s1620_s30 = sshra.s32 %s1302_s28, 4  ;;  %s1621_s30 = int_to_ptr.hbm [resolvable:$true] %s1620_s30 }
 0x12e   : > { %s1622_s5 = scalar_lea.hbm %s1621_s30, 24  ;;  %p1627_p7 = scmp.lt.s32.totalorder %s1621_s30, %s2142_s3 }
 0x12f   : > { %p1623_p4 = scmp.ne.s32.totalorder %s1621_s30, %s1622_s5  ;;  %p1628_p8 = scmp.lt.s32.totalorder %s1626_s4, %s1622_s5 }
 0x131   : > { %p1624_p5 = pnand %p1623_p4, %p1788_p9  ;;  %p1629_p10 = por %p1628_p8, %p1627_p7 }
 0x133   : > { %p1625_p6 = pneg %p1624_p5 }
 0x135   : > { %1202 = vperm.xlu0 %1575, %v1199_v54   ;;  %p1630_p13 = pnand %p1629_p10, %p1625_p6 }
 0x14f   : > { %v2065_v27 = vpop.permute.xlu2 %1045 }
 0x150   : > { %1055 = vst.msk [vmem:[#allocation3 + $0x28] sm:$0xf0] %vm1003_vm3, %v2065_v27 }
 0x157   : > { %v995_v28 = vpop.permute.xlu1 %994  ;;  %v1067_v29 = vpop.permute.xlu2 %1066 }
 0x158   : > { %1004 = vst.msk [vmem:[#allocation3 + $0x10] sm:$0xf0] %vm1003_vm3, %v995_v28 }
 0x15f   : > { %v1020_v30 = vpop.permute.xlu1 %1019  ;;  %v1095_v31 = vpop.permute.xlu2 %1094  ;;  %v1186_v14 = vld [vmem:[#allocation3 + $0x10] sm:$0xff] }
 0x160   : > { %1029 = vst.msk [vmem:[#allocation3 + $0x28] sm:$0xf] %vm977_vm2, %v1020_v30 }
 0x164   : > { %v1069_v12 = vpop.permute.xlu0 %1068 }
 0x165   : > { %v1073_v32 = vsel %vm1072_vm4, %v1067_v29, %v1069_v12 }
 0x166   : > { %1078 = vst [vmem:[#allocation3 + $0x30] sm:$0xf] %v1073_v32 }
 0x167   : > { %v1144_v33 = vpop.permute.xlu2 %1143  ;;  %v1189_v10 = vld [vmem:[#allocation3 + $0x28] sm:$0xff] }
 0x16c   : > { %v1093_v34 = vpop.permute.xlu1 %1092 }
 0x16d   : > { %v1099_v35 = vsel %vm1098_vm5, %v1093_v34, %v1095_v31 }
 0x16e   : > { %1104 = vst [vmem:[#allocation3 + $0x30] sm:$0xf0] %v1099_v35 }
 0x16f   : > { %v1071_v36 = vpop.permute.xlu0 %1070  ;;  %v1148_v37 = vpop.permute.xlu2 %1147 }
 0x170   : > { %v1074_v38 = vsel %vm1072_vm4, %v1069_v12, %v1071_v36  ;;  %1080 = vst.msk [vmem:[#allocation3 + $0x40] sm:$0xf] %vm977_vm2, %v1071_v36 }
 0x171   : > { %1079 = vst [vmem:[#allocation3 + $0x38] sm:$0xf] %v1074_v38 }
 0x172   : > { %1157 = vst.msk [vmem:[#allocation3 + $0x58] sm:$0xf0] %vm1003_vm3, %v1148_v37 }
 0x175   : > { %v1190_v62 = vld [vmem:[#allocation3 + $0x30] sm:$0xff] }
 0x177   : > { %v1118_v39 = vpop.permute.xlu0 %1117  ;;  %v1169_v40 = vpop.permute.xlu2 %1168 }
 0x178   : > { %v1097_v41 = vpop.permute.xlu1 %1096 }
 0x179   : > { %v1100_v0 = vsel %vm1098_vm5, %v1095_v31, %v1097_v41  ;;  %1106 = vst.msk [vmem:[#allocation3 + $0x40] sm:$0xf0] %vm1003_vm3, %v1097_v41 }
 0x17a   : > { %1105 = vst [vmem:[#allocation3 + $0x38] sm:$0xf0] %v1100_v0 }
 0x17f   : > { %v1146_v42 = vpop.permute.xlu0 %1145  ;;  %v2074_v43 = vpop.permute.xlu2 %1041 }
 0x180   : > { %v1150_v44 = vsel %vm1149_vm6, %v1144_v33, %v1146_v42  ;;  %v1151_v45 = vsel %vm1149_vm6, %v1146_v42, %v1148_v37  ;;  %v1120_v46 = vpop.permute.xlu1 %1119  ;;  %v1192_v8 = vld [vmem:[#allocation3 + $0x40] sm:$0xff] }
 0x181   : > { %1155 = vst [vmem:[#allocation3 + $0x48] sm:$0xf0] %v1150_v44  ;;  %v1124_v47 = vsel %vm1123_vm7, %v1118_v39, %v1120_v46  ;;  %v1191_v9 = vld [vmem:[#allocation3 + $0x38] sm:$0xff] }
 0x182   : > { %1156 = vst [vmem:[#allocation3 + $0x50] sm:$0xf0] %v1151_v45 }
 0x183   : > { %1129 = vst [vmem:[#allocation3 + $0x48] sm:$0xf] %v1124_v47 }
 0x187   : > { %v1171_v48 = vpop.permute.xlu0 %1170  ;;  %v993_v49 = vpop.permute.xlu2 %992 }
 0x188   : > { %v1175_v50 = vsel %vm1174_vm8, %v1169_v40, %v1171_v48  ;;  %v1122_v51 = vpop.permute.xlu1 %1121  ;;  %v997_v53 = vsel %vm560_vm1, %v993_v49, %v995_v28 }
 0x189   : > { %1180 = vst [vmem:[#allocation3 + $0x60] sm:$0xf] %v1175_v50  ;;  %v1125_v52 = vsel %vm1123_vm7, %v1120_v46, %v1122_v51 }
 0x18a   : > { %1130 = vst [vmem:[#allocation3 + $0x50] sm:$0xf] %v1125_v52  ;;  %v1193_v61 = vld [vmem:[#allocation3 + $0x48] sm:$0xff] }
 0x18b   : > { %1131 = vst.msk [vmem:[#allocation3 + $0x58] sm:$0xf] %vm977_vm2, %v1122_v51 }
 0x18c   : > { %1002 = vst [vmem:[#allocation3 + $0x8] sm:$0xf0] %v997_v53 }
 0x18f   : > { %v1173_v56 = vpop.permute.xlu0 %1172 }
 0x190   : > { %v1018_v57 = vpop.permute.xlu1 %1017  ;;  %v1176_v58 = vsel %vm1174_vm8, %v1171_v48, %v1173_v56  ;;  %1182 = vst.msk [vmem:[#allocation3 + $0x70] sm:$0xf] %vm977_vm2, %v1173_v56  ;;  %v1196_v59 = vld [vmem:[#allocation3 + $0x60] sm:$0xf] }
 0x191   : > { %v1023_v60 = vsel %vm1021_vm9, %v1018_v57, %v1020_v30  ;;  %1181 = vst [vmem:[#allocation3 + $0x68] sm:$0xf] %v1176_v58  ;;  %1474 = vmatpush.msk.msra.mxu0 %vm1209_vm10, %v1196_v59  ;;  %v1194_v7 = vld [vmem:[#allocation3 + $0x50] sm:$0xff] }
 0x192   : > { %1028 = vst [vmem:[#allocation3 + $0x20] sm:$0xf] %v1023_v60  ;;  %v1195_v6 = vld [vmem:[#allocation3 + $0x58] sm:$0xff] }
 0x193   : > { %1231 = vmatpush.msra.mxu0 %v1193_v61  ;;  %v1185_v20 = vld [vmem:[#allocation3 + $0x8] sm:$0xff] }
 0x195   : > { %1232 = vmatpush.msra.mxu0 %v1190_v62 }
 0x197   : > { %v1016_v63 = vpop.permute.xlu0 %1015  ;;  %v1198_v1 = vld [vmem:[#allocation3 + $0x70] sm:$0xf] }
 0x198   : > { %v991_v2 = vpop.permute.xlu1 %990  ;;  %v1022_v3 = vsel %vm1021_vm9, %v1016_v63, %v1018_v57  ;;  %1478 = vmatpush.msk.msra.mxu2 %vm1209_vm10, %v1198_v1  ;;  %v1197_v4 = vld [vmem:[#allocation3 + $0x68] sm:$0xf] }
 0x199   : > { %v996_v5 = vsel %vm560_vm1, %v991_v2, %v993_v49  ;;  %1027 = vst [vmem:[#allocation3 + $0x18] sm:$0xf] %v1022_v3  ;;  %1476 = vmatpush.msk.msra.mxu1 %vm1209_vm10, %v1197_v4  ;;  %vm1205_vm1 = vcmask 293888  }
 0x19a   : > { %1001 = vst [vmem:[#allocation3] sm:$0xf0] %v996_v5  ;;  %1271 = vmatpush.msra.mxu2 %v1195_v6 }
 0x19b   : > { %1251 = vmatpush.msra.mxu1 %v1194_v7 }
 0x19c   : > { %1272 = vmatpush.msra.mxu2 %v1192_v8 }
 0x19d   : > { %1252 = vmatpush.msra.mxu1 %v1191_v9 }
 0x19e   : > { %1273 = vmatpush.msra.mxu2 %v1189_v10 }
 0x19f   : > { %v1044_v13 = vpop.permute.xlu0 %1043 }
 0x1a0   : > { %v1048_v15 = vsel %vm1047_vm11, %v2074_v43, %v1044_v13  ;;  %v1049_v16 = vsel %vm1047_vm11, %v1044_v13, %v2065_v27  ;;  %1274 = vmatpush.msra.mxu2 %v1186_v14 }
 0x1a1   : > { %1053 = vst [vmem:[#allocation3 + $0x18] sm:$0xf0] %v1048_v15  ;;  %1479 = vmatmul.msk.f32.vlgmr.msra.gmra.mxu2 %vm1205_vm1, %v1183_v11  ;;  %v1184_v19 = vld [vmem:[#allocation3] sm:$0xff] }
 0x1a2   : > { %1054 = vst [vmem:[#allocation3 + $0x20] sm:$0xf0] %v1049_v16 }
 0x1a7   : > { %v1203_v21 = vpop.permute.xlu0 %1202 }
 0x1a8   : > { %v1187_v17 = vld [vmem:[#allocation3 + $0x18] sm:$0xff] }
 0x1a9   : > { %1233 = vmatpush.msra.mxu0 %v1187_v17  ;;  %v1188_v18 = vld [vmem:[#allocation3 + $0x20] sm:$0xff] }
 0x1aa   : > { %1253 = vmatpush.msra.mxu1 %v1188_v18 }
 0x1ab   : > { %1234 = vmatpush.msra.mxu0 %v1184_v19 }
 0x1ac   : > { %1254 = vmatpush.msra.mxu1 %v1185_v20  ;;  %1475 = vmatmul.msk.f32.vlgmr.msra.gmra.mxu0 %vm1205_vm1, %v1183_v11 }
 0x1ad   : > { %1477 = vmatmul.msk.f32.vlgmr.msra.gmra.mxu1 %vm1205_vm1, %v1183_v11 }
 0x224   : > { %v1276_v22 = vpop.f32.mrf.mxu2 }
 0x225   : > { %v1277_v23 = vadd.f32 %v1276_v22, %v1203_v21 }
 0x227   : > { %1282 = vst.msk [vmem:[%s204_s29 + $0x10] sm:$0xff] %vm1281_vm12, %v1277_v23 }
 0x229   : > { %v1236_v24 = vpop.f32.mrf.mxu0 }
 0x22a   : > { %v1256_v25 = vpop.f32.mrf.mxu1  ;;  %v1237_v26 = vadd.f32 %v1236_v24, %v1203_v21 }
 0x22b   : > { %v1257_v27 = vadd.f32 %v1256_v25, %v1203_v21 }
 0x22c   : > { %1279 = vst [vmem:[%s204_s29] sm:$0xff] %v1237_v26 }
 0x22d   : > { %1280 = vst [vmem:[%s204_s29 + $0x8] sm:$0xff] %v1257_v27 }
 0x22e   : > { %1633 = shalt.err (!%p1630_p13)
}
 0x22f   : > { %1488 = dma.vmem_to_hbm [thread:$0]  (%p1788_p9), %s1300_s24, 384, %s1302_s28, %s1284_s15  }
 0x230 PF: > { %s1313_s19 = sand.u32 1, %s1668_s12   ;;  %p1495_p0 = pnand %p1404_p12, %p1795_p11 }
 0x231   : > { %s1314_s10 = scalar_lea.sflag [#allocation6], %s1313_s19 }
 0x232   : > { %p1496_p1 = pneg %p1495_p0 }
 0x234   : > { %1663 = dma.done.wait (%p1496_p1), %s1314_s10, 384  }
 0x235   : > { %1665 = vsyncadd (%p1496_p1), %s1314_s10, 4294966912  ;;  %s19_s17 = sadd.s32 1, %s1688_s17   ;;  %s2147_s12 = smov %s1672_s13 }
 0x236   : > { %p16_p2 = scmp.ge.s32.totalorder %s19_s17, 4   ;;  %s2148_s13 = smov %s1676_s14 }
 0x237   : > { %s2149_s14 = smov %s1793_s26  ;;  %s2150_s15 = smov %s1684_s16 }
 0x238   : > { %s2151_s16 = smov %s2153_s20  ;;  %18 = sbr.rel (!%p16_p2) target bundleno = 6 (0x6), region = 108 }
 0x23d   :  { %1320 = vsyncpa [#allocation5], 1 }
 0x23e   :  { %1322 = vsyncpa [#allocation5 + $0x1], 1 }
 0x23f   :  { %1323 = vsyncpa [#allocation6], 1 }
 0x240   :  { %1325 = vsyncpa [#allocation6 + $0x1], 1 }

</bundles_post_ra>
